<compile_context>
chip_gen: v7x
topology: tpu7x:2x2x1
jax: 0.10.0
libtpu: 0.0.40
codegen_flags: <defaults>
</compile_context>

<pallas_src>
import functools

import jax
import jax.numpy as jnp
from jax.experimental import pallas as pl
from jax.experimental.pallas import tpu as pltpu


# ----------------------------- kernel helpers --------------------------------
def _elu(x):
    return jnp.where(x > 0, x, jnp.exp(jnp.minimum(x, 0.0)) - 1.0)


def _attend(h, f_src, f_dst, mask, alpha):
    """Masked attention + row-normalized aggregation for one GAT layer.

    h     : (N, F_out) projected features
    f_src : (N, 1) = h @ a_src
    f_dst : (N, 1) = h @ a_dst
    mask  : (N, N) bool adjacency predicate (shared across layers)
    """
    # logits[i, j] = f_src[i] + f_dst[j]; only a tiny (N,1)->(1,N) transpose (XLU).
    logits = f_src + jnp.transpose(f_dst)
    lrelu = jnp.where(logits > 0, logits, alpha * logits)
    # Row-wise stabilization (ratio-invariant): subtract the per-row min over
    # edges so every exponent is <= 0 and exp() can never overflow.
    big = jnp.float32(3.0e38)
    m = jnp.min(jnp.where(mask, lrelu, big), axis=1, keepdims=True)      # (N, 1)
    e = jnp.where(mask, jnp.exp(jnp.minimum(m - lrelu, 0.0)), 0.0)       # (N, N)
    # Guard: a node with no unmasked edges gets rowsum=0 -> output 0, not NaN.
    rowsum = jnp.maximum(jnp.sum(e, axis=1, keepdims=True), 1e-30)       # (N, 1)
    # EUP approx reciprocal (free slot) + one Newton step -> ~f32 accuracy.
    r = pl.reciprocal(rowsum, approx=True)
    r = r * (2.0 - rowsum * r)
    return jnp.dot(e, h, preferred_element_type=jnp.float32) * r


# ------------------------------ fused kernel ----------------------------------
def _fused_kernel(x_ref, adjm_ref, w_in_ref, b_in_ref, w_heads_ref, a_heads_ref,
                  w_att_out_ref, a_att_out_ref, w_hid_ref, b_hid_ref,
                  w_fc_ref, b_fc_ref, o_ref, *, alpha, nhid, nheads):
    # Adjacency predicate: computed ONCE, reused by all nheads+1 attention layers.
    mask = adjm_ref[...] != 0                                            # (N, N) bool

    # --- input MLP: relu(x @ W_in + b_in) -------------------------------------
    h0 = jnp.dot(x_ref[...], w_in_ref[...], preferred_element_type=jnp.float32)
    h0 = jnp.maximum(h0 + b_in_ref[...], 0.0)                            # (N, F)

    # --- all attention heads: ONE stacked projection and ONE block-diagonal
    #     attention-vector matmul (no full h transpose) -------------------------
    h_all = jnp.dot(h0, w_heads_ref[...],
                    preferred_element_type=jnp.float32)                  # (N, nheads*nhid)
    f_all = jnp.dot(h_all, a_heads_ref[...],
                    preferred_element_type=jnp.float32)                  # (N, 2*nheads)

    head_outs = []
    for hd in range(nheads):                                             # unrolled, nheads small
        h_h = h_all[:, hd * nhid:(hd + 1) * nhid]                        # (N, nhid)
        f_src = f_all[:, 2 * hd:2 * hd + 1]                              # (N, 1)
        f_dst = f_all[:, 2 * hd + 1:2 * hd + 2]                          # (N, 1)
        head_outs.append(_elu(_attend(h_h, f_src, f_dst, mask, alpha)))  # concat=True -> ELU
    h_cat = jnp.concatenate(head_outs, axis=1)                           # stays in VMEM/vregs

    # --- output attention layer (concat=False) then F.elu ----------------------
    h_o = jnp.dot(h_cat, w_att_out_ref[...],
                  preferred_element_type=jnp.float32)                    # (N, F)
    f_o = jnp.dot(h_o, a_att_out_ref[...],
                  preferred_element_type=jnp.float32)                    # (N, 2)
    h_o = _elu(_attend(h_o, f_o[:, 0:1], f_o[:, 1:2], mask, alpha))

    # --- hidden MLP + output MLP + sigmoid -------------------------------------
    h2 = jnp.dot(h_o, w_hid_ref[...], preferred_element_type=jnp.float32)
    h2 = jnp.maximum(h2 + b_hid_ref[...], 0.0)                           # (N, 10)
    y = jnp.dot(h2, w_fc_ref[...], preferred_element_type=jnp.float32) + b_fc_ref[...]
    y = 1.0 / (1.0 + jnp.exp(-y))                                        # sigmoid, (N, 1)
    o_ref[...] = y.astype(o_ref.dtype)


# --------------------------------- wrapper ------------------------------------
def mlp_gat_mlp_forward(x, adj, params, *, alpha, nhid, nheads):
    N = x.shape[0]
    feat10 = params["W_in"].shape[1]                 # nfeat * 10

    # adj is pure 0/1 structure -> ship it as int8 (4x less HBM->VMEM traffic).
    adjm = (adj != 0).astype(jnp.int8)

    # Stack per-head projections into one matrix and pack per-head attention
    # vectors a = [a_src | a_dst] as a block-diagonal (nheads*nhid, 2*nheads)
    # matrix so all attention logits come from a single MXU matmul.
    W_heads = jnp.concatenate([W for W, _ in params["att_heads"]], axis=1)
    A_bd = jnp.zeros((nheads * nhid, 2 * nheads), jnp.float32)
    for hd, (_, a) in enumerate(params["att_heads"]):
        a_cat = jnp.stack([a[0, :nhid], a[0, nhid:]], axis=1)            # (nhid, 2)
        A_bd = A_bd.at[hd * nhid:(hd + 1) * nhid, 2 * hd:2 * hd + 2].set(a_cat)
    a_out = params["att_out_a"]
    a_out_cat = jnp.stack([a_out[0, :feat10], a_out[0, feat10:]], axis=1)  # (F, 2)

    kernel = functools.partial(_fused_kernel, alpha=alpha, nhid=nhid, nheads=nheads)
    vmem = pl.BlockSpec(memory_space=pltpu.MemorySpace.VMEM)
    return pl.pallas_call(
        kernel,
        out_shape=jax.ShapeDtypeStruct((N, 1), jnp.float32),
        in_specs=[vmem] * 12,
        out_specs=vmem,
    )(x, adjm, params["W_in"], params["b_in"], W_heads, A_bd,
      params["att_out_W"], a_out_cat, params["W_hid"], params["b_hid"],
      params["W_fc"], params["b_fc"])


# ------------------------------ parameter init ---------------------------------
def _xavier_normal(key, shape, gain=1.414):
    std = gain * (2.0 / (shape[0] + shape[1])) ** 0.5
    return std * jax.random.normal(key, shape, jnp.float32)


def _linear_init(key, fan_in, fan_out):
    kw, kb = jax.random.split(key)
    bound = 1.0 / (fan_in ** 0.5)
    W = jax.random.uniform(kw, (fan_in, fan_out), jnp.float32, -bound, bound)
    b = jax.random.uniform(kb, (1, fan_out), jnp.float32, -bound, bound)
    return W, b


def init_params(key, nfeat, nhid, nheads):
    feat10 = nfeat * 10
    keys = jax.random.split(key, 2 * nheads + 5)
    heads = [(_xavier_normal(keys[2 * h], (feat10, nhid)),
              _xavier_normal(keys[2 * h + 1], (1, 2 * nhid))) for h in range(nheads)]
    i = 2 * nheads
    W_in, b_in = _linear_init(keys[i], nfeat, feat10)
    W_hid, b_hid = _linear_init(keys[i + 1], feat10, 10)
    W_fc, b_fc = _linear_init(keys[i + 2], 10, 1)
    return {
        "att_heads": heads,
        "att_out_W": _xavier_normal(keys[i + 3], (nhid * nheads, feat10)),
        "att_out_a": _xavier_normal(keys[i + 4], (1, 2 * feat10)),
        "W_in": W_in, "b_in": b_in,
        "W_hid": W_hid, "b_hid": b_hid,
        "W_fc": W_fc, "b_fc": b_fc,
    }


# ----------------------- pure-JAX reference (same math) ------------------------
def _ref_att_layer(x, adj, W, a, alpha, concat):
    f_out = W.shape[1]
    h = x @ W
    logits = h @ a[:, :f_out].T + (h @ a[:, f_out:].T).T
    lrelu = jnp.where(logits > 0, logits, alpha * logits)
    e = jnp.exp(-lrelu) * (adj != 0).astype(jnp.float32)
    hp = (e @ h) / jnp.sum(e, axis=1, keepdims=True)
    return jax.nn.elu(hp) if concat else hp


def _ref_forward(x, adj, p, alpha):
    h = jax.nn.relu(x @ p["W_in"] + p["b_in"])
    h = jnp.concatenate(
        [_ref_att_layer(h, adj, W, a, alpha, True) for W, a in p["att_heads"]], axis=1)
    h = jax.nn.elu(_ref_att_layer(h, adj, p["att_out_W"], p["att_out_a"], alpha, False))
    h = jax.nn.relu(h @ p["W_hid"] + p["b_hid"])
    return jax.nn.sigmoid(h @ p["W_fc"] + p["b_fc"])


# ----------------------------------- main ---------------------------------------
if __name__ == "__main__":
    N, nfeat, nhid, nheads = 32, 4, 8, 4      # feature dim inside GAT = nfeat*10 = 40
    alpha = 0.2                               # dropout=0.6 is an identity in eval mode

    key = jax.random.PRNGKey(0)
    kx, kadj, kp = jax.random.split(key, 3)

    x = jax.random.normal(kx, (N, nfeat), jnp.float32)
    adj = (jax.random.uniform(kadj, (N, N)) < 0.3).astype(jnp.float32)
    adj = jnp.maximum(adj, jnp.eye(N, dtype=jnp.float32))   # self-loops

    params = init_params(kp, nfeat, nhid, nheads)

    out = mlp_gat_mlp_forward(x, adj, params, alpha=alpha, nhid=nhid, nheads=nheads)
    jax.block_until_ready(out)

    assert out.shape == (N, 1), out.shape
    ref = _ref_forward(x, adj, params, alpha)
    max_err = float(jnp.max(jnp.abs(out - ref)))
    assert jnp.allclose(out, ref, atol=5e-4, rtol=5e-4), max_err

    print("KERNEL_OK")
</pallas_src>

<mosaic_0001>
module attributes {stable_mosaic.version = 11 : i64} {
  func.func @_fused_kernel(%arg0: memref<32x4xf32, #tpu.memory_space<vmem>>, %arg1: memref<32x32xi8, #tpu.memory_space<vmem>>, %arg2: memref<4x40xf32, #tpu.memory_space<vmem>>, %arg3: memref<1x40xf32, #tpu.memory_space<vmem>>, %arg4: memref<40x32xf32, #tpu.memory_space<vmem>>, %arg5: memref<32x8xf32, #tpu.memory_space<vmem>>, %arg6: memref<32x40xf32, #tpu.memory_space<vmem>>, %arg7: memref<40x2xf32, #tpu.memory_space<vmem>>, %arg8: memref<40x10xf32, #tpu.memory_space<vmem>>, %arg9: memref<1x10xf32, #tpu.memory_space<vmem>>, %arg10: memref<10x1xf32, #tpu.memory_space<vmem>>, %arg11: memref<1x1xf32, #tpu.memory_space<vmem>>, %arg12: memref<32x1xf32, #tpu.memory_space<vmem>>) attributes {dimension_semantics = [], scalar_prefetch = 0 : i64, scratch_operands = 0 : i64, tpu.core_type = #tpu.core_type<tc>} {
    %c0 = arith.constant 0 : index
    %c0_0 = arith.constant 0 : index
    %0 = vector.load %arg1[%c0, %c0_0] : memref<32x32xi8, #tpu.memory_space<vmem>>, vector<32x32xi8>
    %c0_i8 = arith.constant 0 : i8
    %1 = vector.broadcast %c0_i8 : i8 to vector<32x32xi8>
    %2 = arith.cmpi ne, %0, %1 : vector<32x32xi8>
    %c0_1 = arith.constant 0 : index
    %c0_2 = arith.constant 0 : index
    %3 = vector.load %arg0[%c0_1, %c0_2] : memref<32x4xf32, #tpu.memory_space<vmem>>, vector<32x4xf32>
    %c0_3 = arith.constant 0 : index
    %c0_4 = arith.constant 0 : index
    %4 = vector.load %arg2[%c0_3, %c0_4] : memref<4x40xf32, #tpu.memory_space<vmem>>, vector<4x40xf32>
    %cst = arith.constant dense<0.000000e+00> : vector<32x40xf32>
    %5 = tpu.matmul %3, %4, %cst {dimension_numbers = #tpu.dot_dimension_numbers<[1], [0], [0], [1], [0, 0, 1, 1], [], []>} : vector<32x4xf32>, vector<4x40xf32>, vector<32x40xf32> -> vector<32x40xf32>
    %c0_5 = arith.constant 0 : index
    %c0_6 = arith.constant 0 : index
    %6 = vector.load %arg3[%c0_5, %c0_6] : memref<1x40xf32, #tpu.memory_space<vmem>>, vector<1x40xf32>
    %7 = vector.broadcast %6 : vector<1x40xf32> to vector<32x40xf32>
    %8 = arith.addf %5, %7 : vector<32x40xf32>
    %cst_7 = arith.constant 0.000000e+00 : f32
    %9 = vector.broadcast %cst_7 : f32 to vector<32x40xf32>
    %10 = arith.maximumf %8, %9 : vector<32x40xf32>
    %c0_8 = arith.constant 0 : index
    %c0_9 = arith.constant 0 : index
    %11 = vector.load %arg4[%c0_8, %c0_9] : memref<40x32xf32, #tpu.memory_space<vmem>>, vector<40x32xf32>
    %cst_10 = arith.constant dense<0.000000e+00> : vector<32x32xf32>
    %12 = tpu.matmul %10, %11, %cst_10 {dimension_numbers = #tpu.dot_dimension_numbers<[1], [0], [0], [1], [0, 0, 1, 1], [], []>} : vector<32x40xf32>, vector<40x32xf32>, vector<32x32xf32> -> vector<32x32xf32>
    %c0_11 = arith.constant 0 : index
    %c0_12 = arith.constant 0 : index
    %13 = vector.load %arg5[%c0_11, %c0_12] : memref<32x8xf32, #tpu.memory_space<vmem>>, vector<32x8xf32>
    %cst_13 = arith.constant dense<0.000000e+00> : vector<32x8xf32>
    %14 = tpu.matmul %12, %13, %cst_13 {dimension_numbers = #tpu.dot_dimension_numbers<[1], [0], [0], [1], [0, 0, 1, 1], [], []>} : vector<32x32xf32>, vector<32x8xf32>, vector<32x8xf32> -> vector<32x8xf32>
    %15 = vector.extract_strided_slice %12 {offsets = [0, 0], sizes = [32, 8], strides = [1, 1]} : vector<32x32xf32> to vector<32x8xf32>
    %16 = vector.extract_strided_slice %14 {offsets = [0, 0], sizes = [32, 1], strides = [1, 1]} : vector<32x8xf32> to vector<32x1xf32>
    %17 = vector.extract_strided_slice %14 {offsets = [0, 1], sizes = [32, 1], strides = [1, 1]} : vector<32x8xf32> to vector<32x1xf32>
    %18 = tpu.transpose %17, [1, 0] : vector<32x1xf32> -> vector<1x32xf32>
    %19 = vector.broadcast %16 : vector<32x1xf32> to vector<32x32xf32>
    %20 = vector.broadcast %18 : vector<1x32xf32> to vector<32x32xf32>
    %21 = arith.addf %19, %20 : vector<32x32xf32>
    %cst_14 = arith.constant 0.000000e+00 : f32
    %22 = vector.broadcast %cst_14 : f32 to vector<32x32xf32>
    %23 = arith.cmpf ogt, %21, %22 : vector<32x32xf32>
    %cst_15 = arith.constant 2.000000e-01 : f32
    %24 = vector.broadcast %cst_15 : f32 to vector<32x32xf32>
    %25 = arith.mulf %24, %21 : vector<32x32xf32>
    %26 = arith.select %23, %21, %25 : vector<32x32xi1>, vector<32x32xf32>
    %cst_16 = arith.constant 3.000000e+38 : f32
    %27 = vector.broadcast %cst_16 : f32 to vector<32x32xf32>
    %28 = arith.select %2, %26, %27 : vector<32x32xi1>, vector<32x32xf32>
    %cst_17 = arith.constant dense<0x7F800000> : vector<32xf32>
    %29 = vector.multi_reduction <minimumf>, %28, %cst_17 [1] : vector<32x32xf32> to vector<32xf32>
    %30 = vector.shape_cast %29 : vector<32xf32> to vector<32x1xf32>
    %31 = vector.broadcast %30 : vector<32x1xf32> to vector<32x32xf32>
    %32 = arith.subf %31, %26 : vector<32x32xf32>
    %cst_18 = arith.constant 0.000000e+00 : f32
    %33 = vector.broadcast %cst_18 : f32 to vector<32x32xf32>
    %34 = arith.minimumf %32, %33 : vector<32x32xf32>
    %35 = math.exp %34 : vector<32x32xf32>
    %cst_19 = arith.constant 0.000000e+00 : f32
    %36 = vector.broadcast %cst_19 : f32 to vector<32x32xf32>
    %37 = arith.select %2, %35, %36 : vector<32x32xi1>, vector<32x32xf32>
    %cst_20 = arith.constant dense<0.000000e+00> : vector<32xf32>
    %38 = vector.multi_reduction <add>, %37, %cst_20 [1] : vector<32x32xf32> to vector<32xf32>
    %39 = vector.shape_cast %38 : vector<32xf32> to vector<32x1xf32>
    %cst_21 = arith.constant 1.000000e-30 : f32
    %40 = vector.broadcast %cst_21 : f32 to vector<32x1xf32>
    %41 = arith.maximumf %39, %40 : vector<32x1xf32>
    %42 = tpu.reciprocal %41 {approx = true} : vector<32x1xf32> -> vector<32x1xf32>
    %43 = arith.mulf %41, %42 : vector<32x1xf32>
    %cst_22 = arith.constant 2.000000e+00 : f32
    %44 = vector.broadcast %cst_22 : f32 to vector<32x1xf32>
    %45 = arith.subf %44, %43 : vector<32x1xf32>
    %46 = arith.mulf %42, %45 : vector<32x1xf32>
    %cst_23 = arith.constant dense<0.000000e+00> : vector<32x8xf32>
    %47 = tpu.matmul %37, %15, %cst_23 {dimension_numbers = #tpu.dot_dimension_numbers<[1], [0], [0], [1], [0, 0, 1, 1], [], []>} : vector<32x32xf32>, vector<32x8xf32>, vector<32x8xf32> -> vector<32x8xf32>
    %48 = vector.broadcast %46 : vector<32x1xf32> to vector<32x8xf32>
    %49 = arith.mulf %47, %48 : vector<32x8xf32>
    %cst_24 = arith.constant 0.000000e+00 : f32
    %50 = vector.broadcast %cst_24 : f32 to vector<32x8xf32>
    %51 = arith.cmpf ogt, %49, %50 : vector<32x8xf32>
    %cst_25 = arith.constant 0.000000e+00 : f32
    %52 = vector.broadcast %cst_25 : f32 to vector<32x8xf32>
    %53 = arith.minimumf %49, %52 : vector<32x8xf32>
    %54 = math.exp %53 : vector<32x8xf32>
    %cst_26 = arith.constant 1.000000e+00 : f32
    %55 = vector.broadcast %cst_26 : f32 to vector<32x8xf32>
    %56 = arith.subf %54, %55 : vector<32x8xf32>
    %57 = arith.select %51, %49, %56 : vector<32x8xi1>, vector<32x8xf32>
    %58 = vector.extract_strided_slice %12 {offsets = [0, 8], sizes = [32, 8], strides = [1, 1]} : vector<32x32xf32> to vector<32x8xf32>
    %59 = vector.extract_strided_slice %14 {offsets = [0, 2], sizes = [32, 1], strides = [1, 1]} : vector<32x8xf32> to vector<32x1xf32>
    %60 = vector.extract_strided_slice %14 {offsets = [0, 3], sizes = [32, 1], strides = [1, 1]} : vector<32x8xf32> to vector<32x1xf32>
    %61 = tpu.transpose %60, [1, 0] : vector<32x1xf32> -> vector<1x32xf32>
    %62 = vector.broadcast %59 : vector<32x1xf32> to vector<32x32xf32>
    %63 = vector.broadcast %61 : vector<1x32xf32> to vector<32x32xf32>
    %64 = arith.addf %62, %63 : vector<32x32xf32>
    %cst_27 = arith.constant 0.000000e+00 : f32
    %65 = vector.broadcast %cst_27 : f32 to vector<32x32xf32>
    %66 = arith.cmpf ogt, %64, %65 : vector<32x32xf32>
    %cst_28 = arith.constant 2.000000e-01 : f32
    %67 = vector.broadcast %cst_28 : f32 to vector<32x32xf32>
    %68 = arith.mulf %67, %64 : vector<32x32xf32>
    %69 = arith.select %66, %64, %68 : vector<32x32xi1>, vector<32x32xf32>
    %cst_29 = arith.constant 3.000000e+38 : f32
    %70 = vector.broadcast %cst_29 : f32 to vector<32x32xf32>
    %71 = arith.select %2, %69, %70 : vector<32x32xi1>, vector<32x32xf32>
    %cst_30 = arith.constant dense<0x7F800000> : vector<32xf32>
    %72 = vector.multi_reduction <minimumf>, %71, %cst_30 [1] : vector<32x32xf32> to vector<32xf32>
    %73 = vector.shape_cast %72 : vector<32xf32> to vector<32x1xf32>
    %74 = vector.broadcast %73 : vector<32x1xf32> to vector<32x32xf32>
    %75 = arith.subf %74, %69 : vector<32x32xf32>
    %cst_31 = arith.constant 0.000000e+00 : f32
    %76 = vector.broadcast %cst_31 : f32 to vector<32x32xf32>
    %77 = arith.minimumf %75, %76 : vector<32x32xf32>
    %78 = math.exp %77 : vector<32x32xf32>
    %cst_32 = arith.constant 0.000000e+00 : f32
    %79 = vector.broadcast %cst_32 : f32 to vector<32x32xf32>
    %80 = arith.select %2, %78, %79 : vector<32x32xi1>, vector<32x32xf32>
    %cst_33 = arith.constant dense<0.000000e+00> : vector<32xf32>
    %81 = vector.multi_reduction <add>, %80, %cst_33 [1] : vector<32x32xf32> to vector<32xf32>
    %82 = vector.shape_cast %81 : vector<32xf32> to vector<32x1xf32>
    %cst_34 = arith.constant 1.000000e-30 : f32
    %83 = vector.broadcast %cst_34 : f32 to vector<32x1xf32>
    %84 = arith.maximumf %82, %83 : vector<32x1xf32>
    %85 = tpu.reciprocal %84 {approx = true} : vector<32x1xf32> -> vector<32x1xf32>
    %86 = arith.mulf %84, %85 : vector<32x1xf32>
    %cst_35 = arith.constant 2.000000e+00 : f32
    %87 = vector.broadcast %cst_35 : f32 to vector<32x1xf32>
    %88 = arith.subf %87, %86 : vector<32x1xf32>
    %89 = arith.mulf %85, %88 : vector<32x1xf32>
    %cst_36 = arith.constant dense<0.000000e+00> : vector<32x8xf32>
    %90 = tpu.matmul %80, %58, %cst_36 {dimension_numbers = #tpu.dot_dimension_numbers<[1], [0], [0], [1], [0, 0, 1, 1], [], []>} : vector<32x32xf32>, vector<32x8xf32>, vector<32x8xf32> -> vector<32x8xf32>
    %91 = vector.broadcast %89 : vector<32x1xf32> to vector<32x8xf32>
    %92 = arith.mulf %90, %91 : vector<32x8xf32>
    %cst_37 = arith.constant 0.000000e+00 : f32
    %93 = vector.broadcast %cst_37 : f32 to vector<32x8xf32>
    %94 = arith.cmpf ogt, %92, %93 : vector<32x8xf32>
    %cst_38 = arith.constant 0.000000e+00 : f32
    %95 = vector.broadcast %cst_38 : f32 to vector<32x8xf32>
    %96 = arith.minimumf %92, %95 : vector<32x8xf32>
    %97 = math.exp %96 : vector<32x8xf32>
    %cst_39 = arith.constant 1.000000e+00 : f32
    %98 = vector.broadcast %cst_39 : f32 to vector<32x8xf32>
    %99 = arith.subf %97, %98 : vector<32x8xf32>
    %100 = arith.select %94, %92, %99 : vector<32x8xi1>, vector<32x8xf32>
    %101 = vector.extract_strided_slice %12 {offsets = [0, 16], sizes = [32, 8], strides = [1, 1]} : vector<32x32xf32> to vector<32x8xf32>
    %102 = vector.extract_strided_slice %14 {offsets = [0, 4], sizes = [32, 1], strides = [1, 1]} : vector<32x8xf32> to vector<32x1xf32>
    %103 = vector.extract_strided_slice %14 {offsets = [0, 5], sizes = [32, 1], strides = [1, 1]} : vector<32x8xf32> to vector<32x1xf32>
    %104 = tpu.transpose %103, [1, 0] : vector<32x1xf32> -> vector<1x32xf32>
    %105 = vector.broadcast %102 : vector<32x1xf32> to vector<32x32xf32>
    %106 = vector.broadcast %104 : vector<1x32xf32> to vector<32x32xf32>
    %107 = arith.addf %105, %106 : vector<32x32xf32>
    %cst_40 = arith.constant 0.000000e+00 : f32
    %108 = vector.broadcast %cst_40 : f32 to vector<32x32xf32>
    %109 = arith.cmpf ogt, %107, %108 : vector<32x32xf32>
    %cst_41 = arith.constant 2.000000e-01 : f32
    %110 = vector.broadcast %cst_41 : f32 to vector<32x32xf32>
    %111 = arith.mulf %110, %107 : vector<32x32xf32>
    %112 = arith.select %109, %107, %111 : vector<32x32xi1>, vector<32x32xf32>
    %cst_42 = arith.constant 3.000000e+38 : f32
    %113 = vector.broadcast %cst_42 : f32 to vector<32x32xf32>
    %114 = arith.select %2, %112, %113 : vector<32x32xi1>, vector<32x32xf32>
    %cst_43 = arith.constant dense<0x7F800000> : vector<32xf32>
    %115 = vector.multi_reduction <minimumf>, %114, %cst_43 [1] : vector<32x32xf32> to vector<32xf32>
    %116 = vector.shape_cast %115 : vector<32xf32> to vector<32x1xf32>
    %117 = vector.broadcast %116 : vector<32x1xf32> to vector<32x32xf32>
    %118 = arith.subf %117, %112 : vector<32x32xf32>
    %cst_44 = arith.constant 0.000000e+00 : f32
    %119 = vector.broadcast %cst_44 : f32 to vector<32x32xf32>
    %120 = arith.minimumf %118, %119 : vector<32x32xf32>
    %121 = math.exp %120 : vector<32x32xf32>
    %cst_45 = arith.constant 0.000000e+00 : f32
    %122 = vector.broadcast %cst_45 : f32 to vector<32x32xf32>
    %123 = arith.select %2, %121, %122 : vector<32x32xi1>, vector<32x32xf32>
    %cst_46 = arith.constant dense<0.000000e+00> : vector<32xf32>
    %124 = vector.multi_reduction <add>, %123, %cst_46 [1] : vector<32x32xf32> to vector<32xf32>
    %125 = vector.shape_cast %124 : vector<32xf32> to vector<32x1xf32>
    %cst_47 = arith.constant 1.000000e-30 : f32
    %126 = vector.broadcast %cst_47 : f32 to vector<32x1xf32>
    %127 = arith.maximumf %125, %126 : vector<32x1xf32>
    %128 = tpu.reciprocal %127 {approx = true} : vector<32x1xf32> -> vector<32x1xf32>
    %129 = arith.mulf %127, %128 : vector<32x1xf32>
    %cst_48 = arith.constant 2.000000e+00 : f32
    %130 = vector.broadcast %cst_48 : f32 to vector<32x1xf32>
    %131 = arith.subf %130, %129 : vector<32x1xf32>
    %132 = arith.mulf %128, %131 : vector<32x1xf32>
    %cst_49 = arith.constant dense<0.000000e+00> : vector<32x8xf32>
    %133 = tpu.matmul %123, %101, %cst_49 {dimension_numbers = #tpu.dot_dimension_numbers<[1], [0], [0], [1], [0, 0, 1, 1], [], []>} : vector<32x32xf32>, vector<32x8xf32>, vector<32x8xf32> -> vector<32x8xf32>
    %134 = vector.broadcast %132 : vector<32x1xf32> to vector<32x8xf32>
    %135 = arith.mulf %133, %134 : vector<32x8xf32>
    %cst_50 = arith.constant 0.000000e+00 : f32
    %136 = vector.broadcast %cst_50 : f32 to vector<32x8xf32>
    %137 = arith.cmpf ogt, %135, %136 : vector<32x8xf32>
    %cst_51 = arith.constant 0.000000e+00 : f32
    %138 = vector.broadcast %cst_51 : f32 to vector<32x8xf32>
    %139 = arith.minimumf %135, %138 : vector<32x8xf32>
    %140 = math.exp %139 : vector<32x8xf32>
    %cst_52 = arith.constant 1.000000e+00 : f32
    %141 = vector.broadcast %cst_52 : f32 to vector<32x8xf32>
    %142 = arith.subf %140, %141 : vector<32x8xf32>
    %143 = arith.select %137, %135, %142 : vector<32x8xi1>, vector<32x8xf32>
    %144 = vector.extract_strided_slice %12 {offsets = [0, 24], sizes = [32, 8], strides = [1, 1]} : vector<32x32xf32> to vector<32x8xf32>
    %145 = vector.extract_strided_slice %14 {offsets = [0, 6], sizes = [32, 1], strides = [1, 1]} : vector<32x8xf32> to vector<32x1xf32>
    %146 = vector.extract_strided_slice %14 {offsets = [0, 7], sizes = [32, 1], strides = [1, 1]} : vector<32x8xf32> to vector<32x1xf32>
    %147 = tpu.transpose %146, [1, 0] : vector<32x1xf32> -> vector<1x32xf32>
    %148 = vector.broadcast %145 : vector<32x1xf32> to vector<32x32xf32>
    %149 = vector.broadcast %147 : vector<1x32xf32> to vector<32x32xf32>
    %150 = arith.addf %148, %149 : vector<32x32xf32>
    %cst_53 = arith.constant 0.000000e+00 : f32
    %151 = vector.broadcast %cst_53 : f32 to vector<32x32xf32>
    %152 = arith.cmpf ogt, %150, %151 : vector<32x32xf32>
    %cst_54 = arith.constant 2.000000e-01 : f32
    %153 = vector.broadcast %cst_54 : f32 to vector<32x32xf32>
    %154 = arith.mulf %153, %150 : vector<32x32xf32>
    %155 = arith.select %152, %150, %154 : vector<32x32xi1>, vector<32x32xf32>
    %cst_55 = arith.constant 3.000000e+38 : f32
    %156 = vector.broadcast %cst_55 : f32 to vector<32x32xf32>
    %157 = arith.select %2, %155, %156 : vector<32x32xi1>, vector<32x32xf32>
    %cst_56 = arith.constant dense<0x7F800000> : vector<32xf32>
    %158 = vector.multi_reduction <minimumf>, %157, %cst_56 [1] : vector<32x32xf32> to vector<32xf32>
    %159 = vector.shape_cast %158 : vector<32xf32> to vector<32x1xf32>
    %160 = vector.broadcast %159 : vector<32x1xf32> to vector<32x32xf32>
    %161 = arith.subf %160, %155 : vector<32x32xf32>
    %cst_57 = arith.constant 0.000000e+00 : f32
    %162 = vector.broadcast %cst_57 : f32 to vector<32x32xf32>
    %163 = arith.minimumf %161, %162 : vector<32x32xf32>
    %164 = math.exp %163 : vector<32x32xf32>
    %cst_58 = arith.constant 0.000000e+00 : f32
    %165 = vector.broadcast %cst_58 : f32 to vector<32x32xf32>
    %166 = arith.select %2, %164, %165 : vector<32x32xi1>, vector<32x32xf32>
    %cst_59 = arith.constant dense<0.000000e+00> : vector<32xf32>
    %167 = vector.multi_reduction <add>, %166, %cst_59 [1] : vector<32x32xf32> to vector<32xf32>
    %168 = vector.shape_cast %167 : vector<32xf32> to vector<32x1xf32>
    %cst_60 = arith.constant 1.000000e-30 : f32
    %169 = vector.broadcast %cst_60 : f32 to vector<32x1xf32>
    %170 = arith.maximumf %168, %169 : vector<32x1xf32>
    %171 = tpu.reciprocal %170 {approx = true} : vector<32x1xf32> -> vector<32x1xf32>
    %172 = arith.mulf %170, %171 : vector<32x1xf32>
    %cst_61 = arith.constant 2.000000e+00 : f32
    %173 = vector.broadcast %cst_61 : f32 to vector<32x1xf32>
    %174 = arith.subf %173, %172 : vector<32x1xf32>
    %175 = arith.mulf %171, %174 : vector<32x1xf32>
    %cst_62 = arith.constant dense<0.000000e+00> : vector<32x8xf32>
    %176 = tpu.matmul %166, %144, %cst_62 {dimension_numbers = #tpu.dot_dimension_numbers<[1], [0], [0], [1], [0, 0, 1, 1], [], []>} : vector<32x32xf32>, vector<32x8xf32>, vector<32x8xf32> -> vector<32x8xf32>
    %177 = vector.broadcast %175 : vector<32x1xf32> to vector<32x8xf32>
    %178 = arith.mulf %176, %177 : vector<32x8xf32>
    %cst_63 = arith.constant 0.000000e+00 : f32
    %179 = vector.broadcast %cst_63 : f32 to vector<32x8xf32>
    %180 = arith.cmpf ogt, %178, %179 : vector<32x8xf32>
    %cst_64 = arith.constant 0.000000e+00 : f32
    %181 = vector.broadcast %cst_64 : f32 to vector<32x8xf32>
    %182 = arith.minimumf %178, %181 : vector<32x8xf32>
    %183 = math.exp %182 : vector<32x8xf32>
    %cst_65 = arith.constant 1.000000e+00 : f32
    %184 = vector.broadcast %cst_65 : f32 to vector<32x8xf32>
    %185 = arith.subf %183, %184 : vector<32x8xf32>
    %186 = arith.select %180, %178, %185 : vector<32x8xi1>, vector<32x8xf32>
    %187 = tpu.concatenate %57, %100, %143, %186 in 1 : vector<32x8xf32>, vector<32x8xf32>, vector<32x8xf32>, vector<32x8xf32> -> vector<32x32xf32>
    %c0_66 = arith.constant 0 : index
    %c0_67 = arith.constant 0 : index
    %188 = vector.load %arg6[%c0_66, %c0_67] : memref<32x40xf32, #tpu.memory_space<vmem>>, vector<32x40xf32>
    %cst_68 = arith.constant dense<0.000000e+00> : vector<32x40xf32>
    %189 = tpu.matmul %187, %188, %cst_68 {dimension_numbers = #tpu.dot_dimension_numbers<[1], [0], [0], [1], [0, 0, 1, 1], [], []>} : vector<32x32xf32>, vector<32x40xf32>, vector<32x40xf32> -> vector<32x40xf32>
    %c0_69 = arith.constant 0 : index
    %c0_70 = arith.constant 0 : index
    %190 = vector.load %arg7[%c0_69, %c0_70] : memref<40x2xf32, #tpu.memory_space<vmem>>, vector<40x2xf32>
    %cst_71 = arith.constant dense<0.000000e+00> : vector<32x2xf32>
    %191 = tpu.matmul %189, %190, %cst_71 {dimension_numbers = #tpu.dot_dimension_numbers<[1], [0], [0], [1], [0, 0, 1, 1], [], []>} : vector<32x40xf32>, vector<40x2xf32>, vector<32x2xf32> -> vector<32x2xf32>
    %192 = vector.extract_strided_slice %191 {offsets = [0, 0], sizes = [32, 1], strides = [1, 1]} : vector<32x2xf32> to vector<32x1xf32>
    %193 = vector.extract_strided_slice %191 {offsets = [0, 1], sizes = [32, 1], strides = [1, 1]} : vector<32x2xf32> to vector<32x1xf32>
    %194 = tpu.transpose %193, [1, 0] : vector<32x1xf32> -> vector<1x32xf32>
    %195 = vector.broadcast %192 : vector<32x1xf32> to vector<32x32xf32>
    %196 = vector.broadcast %194 : vector<1x32xf32> to vector<32x32xf32>
    %197 = arith.addf %195, %196 : vector<32x32xf32>
    %cst_72 = arith.constant 0.000000e+00 : f32
    %198 = vector.broadcast %cst_72 : f32 to vector<32x32xf32>
    %199 = arith.cmpf ogt, %197, %198 : vector<32x32xf32>
    %cst_73 = arith.constant 2.000000e-01 : f32
    %200 = vector.broadcast %cst_73 : f32 to vector<32x32xf32>
    %201 = arith.mulf %200, %197 : vector<32x32xf32>
    %202 = arith.select %199, %197, %201 : vector<32x32xi1>, vector<32x32xf32>
    %cst_74 = arith.constant 3.000000e+38 : f32
    %203 = vector.broadcast %cst_74 : f32 to vector<32x32xf32>
    %204 = arith.select %2, %202, %203 : vector<32x32xi1>, vector<32x32xf32>
    %cst_75 = arith.constant dense<0x7F800000> : vector<32xf32>
    %205 = vector.multi_reduction <minimumf>, %204, %cst_75 [1] : vector<32x32xf32> to vector<32xf32>
    %206 = vector.shape_cast %205 : vector<32xf32> to vector<32x1xf32>
    %207 = vector.broadcast %206 : vector<32x1xf32> to vector<32x32xf32>
    %208 = arith.subf %207, %202 : vector<32x32xf32>
    %cst_76 = arith.constant 0.000000e+00 : f32
    %209 = vector.broadcast %cst_76 : f32 to vector<32x32xf32>
    %210 = arith.minimumf %208, %209 : vector<32x32xf32>
    %211 = math.exp %210 : vector<32x32xf32>
    %cst_77 = arith.constant 0.000000e+00 : f32
    %212 = vector.broadcast %cst_77 : f32 to vector<32x32xf32>
    %213 = arith.select %2, %211, %212 : vector<32x32xi1>, vector<32x32xf32>
    %cst_78 = arith.constant dense<0.000000e+00> : vector<32xf32>
    %214 = vector.multi_reduction <add>, %213, %cst_78 [1] : vector<32x32xf32> to vector<32xf32>
    %215 = vector.shape_cast %214 : vector<32xf32> to vector<32x1xf32>
    %cst_79 = arith.constant 1.000000e-30 : f32
    %216 = vector.broadcast %cst_79 : f32 to vector<32x1xf32>
    %217 = arith.maximumf %215, %216 : vector<32x1xf32>
    %218 = tpu.reciprocal %217 {approx = true} : vector<32x1xf32> -> vector<32x1xf32>
    %219 = arith.mulf %217, %218 : vector<32x1xf32>
    %cst_80 = arith.constant 2.000000e+00 : f32
    %220 = vector.broadcast %cst_80 : f32 to vector<32x1xf32>
    %221 = arith.subf %220, %219 : vector<32x1xf32>
    %222 = arith.mulf %218, %221 : vector<32x1xf32>
    %cst_81 = arith.constant dense<0.000000e+00> : vector<32x40xf32>
    %223 = tpu.matmul %213, %189, %cst_81 {dimension_numbers = #tpu.dot_dimension_numbers<[1], [0], [0], [1], [0, 0, 1, 1], [], []>} : vector<32x32xf32>, vector<32x40xf32>, vector<32x40xf32> -> vector<32x40xf32>
    %224 = vector.broadcast %222 : vector<32x1xf32> to vector<32x40xf32>
    %225 = arith.mulf %223, %224 : vector<32x40xf32>
    %cst_82 = arith.constant 0.000000e+00 : f32
    %226 = vector.broadcast %cst_82 : f32 to vector<32x40xf32>
    %227 = arith.cmpf ogt, %225, %226 : vector<32x40xf32>
    %cst_83 = arith.constant 0.000000e+00 : f32
    %228 = vector.broadcast %cst_83 : f32 to vector<32x40xf32>
    %229 = arith.minimumf %225, %228 : vector<32x40xf32>
    %230 = math.exp %229 : vector<32x40xf32>
    %cst_84 = arith.constant 1.000000e+00 : f32
    %231 = vector.broadcast %cst_84 : f32 to vector<32x40xf32>
    %232 = arith.subf %230, %231 : vector<32x40xf32>
    %233 = arith.select %227, %225, %232 : vector<32x40xi1>, vector<32x40xf32>
    %c0_85 = arith.constant 0 : index
    %c0_86 = arith.constant 0 : index
    %234 = vector.load %arg8[%c0_85, %c0_86] : memref<40x10xf32, #tpu.memory_space<vmem>>, vector<40x10xf32>
    %cst_87 = arith.constant dense<0.000000e+00> : vector<32x10xf32>
    %235 = tpu.matmul %233, %234, %cst_87 {dimension_numbers = #tpu.dot_dimension_numbers<[1], [0], [0], [1], [0, 0, 1, 1], [], []>} : vector<32x40xf32>, vector<40x10xf32>, vector<32x10xf32> -> vector<32x10xf32>
    %c0_88 = arith.constant 0 : index
    %c0_89 = arith.constant 0 : index
    %236 = vector.load %arg9[%c0_88, %c0_89] : memref<1x10xf32, #tpu.memory_space<vmem>>, vector<1x10xf32>
    %237 = vector.broadcast %236 : vector<1x10xf32> to vector<32x10xf32>
    %238 = arith.addf %235, %237 : vector<32x10xf32>
    %cst_90 = arith.constant 0.000000e+00 : f32
    %239 = vector.broadcast %cst_90 : f32 to vector<32x10xf32>
    %240 = arith.maximumf %238, %239 : vector<32x10xf32>
    %c0_91 = arith.constant 0 : index
    %c0_92 = arith.constant 0 : index
    %241 = vector.load %arg10[%c0_91, %c0_92] : memref<10x1xf32, #tpu.memory_space<vmem>>, vector<10x1xf32>
    %cst_93 = arith.constant dense<0.000000e+00> : vector<32x1xf32>
    %242 = tpu.matmul %240, %241, %cst_93 {dimension_numbers = #tpu.dot_dimension_numbers<[1], [0], [0], [1], [0, 0, 1, 1], [], []>} : vector<32x10xf32>, vector<10x1xf32>, vector<32x1xf32> -> vector<32x1xf32>
    %c0_94 = arith.constant 0 : index
    %c0_95 = arith.constant 0 : index
    %243 = vector.load %arg11[%c0_94, %c0_95] : memref<1x1xf32, #tpu.memory_space<vmem>>, vector<1x1xf32>
    %244 = vector.broadcast %243 : vector<1x1xf32> to vector<32x1xf32>
    %245 = arith.addf %242, %244 : vector<32x1xf32>
    %cst_96 = arith.constant 0.000000e+00 : f32
    %246 = vector.broadcast %cst_96 : f32 to vector<32x1xf32>
    %247 = arith.subf %246, %245 : vector<32x1xf32>
    %248 = math.exp %247 : vector<32x1xf32>
    %cst_97 = arith.constant 1.000000e+00 : f32
    %249 = vector.broadcast %cst_97 : f32 to vector<32x1xf32>
    %250 = arith.addf %249, %248 : vector<32x1xf32>
    %cst_98 = arith.constant 1.000000e+00 : f32
    %251 = vector.broadcast %cst_98 : f32 to vector<32x1xf32>
    %252 = arith.divf %251, %250 : vector<32x1xf32>
    %c0_99 = arith.constant 0 : index
    %c0_100 = arith.constant 0 : index
    %253 = vector.load %arg12[%c0_99, %c0_100] : memref<32x1xf32, #tpu.memory_space<vmem>>, vector<32x1xf32>
    tpu.vector_store %arg12[%c0_99, %c0_100], %252 {strides = array<i32>} : memref<32x1xf32, #tpu.memory_space<vmem>>, vector<32x1xf32>,
    return
  }
}

</mosaic_0001>

<bundles_post_ra>
// kernel: tpu_custom_call.1
= control target key start
LH: loop header
LB: loop body
LE: loop exit
PB: predicated region body
PF: predicated region fallthrough
CT: control target
= control target key end

     0   :  { %vm72_vm0 = vcmask 1043456   ;;  %vm59_vm1 = vcmask 31744   ;;  %vm170_vm2 = vcmask 326656   ;;  %vm272_vm3 = vcmask 261120   ;;  %s2950_s30 = smov 104   ;;  %s2954_s13 = smov 123   ;;  %s3608_s2 = inlined_call_operand.vmem [shape: f32[4,40], index: 2, kind: input, shape index: {}]   ;;  %s3609_s0 = inlined_call_operand.vmem [shape: f32[32,4], index: 0, kind: input, shape index: {}]   ;;  %s3610_s4 = inlined_call_operand.vmem [shape: f32[40,32], index: 4, kind: input, shape index: {}]   ;;  %s3611_s5 = inlined_call_operand.vmem [shape: f32[32,8], index: 5, kind: input, shape index: {}]   ;;  %s3612_s3 = inlined_call_operand.vmem [shape: f32[1,40], index: 3, kind: input, shape index: {}]   ;;  %s3613_s1 = inlined_call_operand.vmem [shape: s8[32,32], index: 1, kind: input, shape index: {}]   ;;  %s3614_s6 = inlined_call_operand.vmem [shape: f32[32,40], index: 6, kind: input, shape index: {}]   ;;  %s3615_s7 = inlined_call_operand.vmem [shape: f32[40,2], index: 7, kind: input, shape index: {}]   ;;  %s3616_s8 = inlined_call_operand.vmem [shape: f32[40,10], index: 8, kind: input, shape index: {}]   ;;  %s3617_s10 = inlined_call_operand.vmem [shape: f32[10,1], index: 10, kind: input, shape index: {}]   ;;  %s3618_s11 = inlined_call_operand.<no memory space> [shape: f32[1,1], index: 11, kind: input, shape index: {}]   ;;  %s3619_s9 = inlined_call_operand.vmem [shape: f32[1,10], index: 9, kind: input, shape index: {}]   ;;  %s3620_s12 = inlined_call_operand.vmem [shape: f32[32,1], index: 12, kind: output, shape index: {}]  }
   0x1   :  { %v51_v0 = vld [vmem:[%s3608_s2] sm:$0xf]  ;;  %v48_v2 = vld [vmem:[%s3609_s0 + $0x8] sm:$0xff]  ;;  %v49_v3 = vld [vmem:[%s3609_s0 + $0x10] sm:$0xff]  ;;  %v2951_v39 = vmov 2   ;;  %v2952_v40 = vmov 0  }
   0x2   :  { %v47_v1 = vld [vmem:[%s3609_s0] sm:$0xff]  ;;  %2498 = vmatprep.subr.msk.mxu1 %vm72_vm0, %v51_v0  ;;  %v166_v5 = vld [vmem:[%s3610_s4 + $0x8] sm:$0xff]  ;;  %v50_v7 = vld [vmem:[%s3609_s0 + $0x18] sm:$0xff]  ;;  %2785 = vset.pattern.permute.xlu0 %v2951_v39  ;;  %s2953_s2 = smov 127   ;;  %s2955_s14 = smov 125   ;;  %v2957_v61 = vmov 6  }
   0x3   :  { %2500 = vmatprep.mubr.msk.f32.mxu1 %vm59_vm1, %v47_v1  ;;  %v165_v4 = vld [vmem:[%s3610_s4] sm:$0xff]  ;;  %2499 = vmatpush3.msk.msra.mxu1 %vm72_vm0, %v51_v0  ;;  %v167_v8 = vld [vmem:[%s3610_s4 + $0x10] sm:$0xff]  ;;  %v168_v9 = vld [vmem:[%s3610_s4 + $0x18] sm:$0xff]  ;;  %s2956_s15 = smov 121   ;;  %v2958_v62 = vmov 4   ;;  %s2961_s25 = smov 16  }
   0x4   :  { %2501 = vmatmul.mubr.msk.f32.vlgmr.msra.gmra.mrb[0].mxu1 %vm59_vm1, %v48_v2  ;;  %v2662_v6 = vpack.c.bf16 %v166_v5, %v165_v4  ;;  %v2666_v10 = vpack.c.bf16 %v168_v9, %v167_v8  ;;  %v169_v11 = vld [vmem:[%s3610_s4 + $0x20] sm:$0xff]  ;;  %v269_v13 = vld [vmem:[%s3611_s5 + $0x8] sm:$0xff]  ;;  %v270_v14 = vld [vmem:[%s3611_s5 + $0x10] sm:$0xff]  ;;  %2784 = vset.pattern.permute.xlu1 %v2952_v40 }
   0x5   :  { %2503 = vmatprep.mubr.msk.f32.mxu1 %vm59_vm1, %v49_v3  ;;  %v268_v12 = vld [vmem:[%s3611_s5] sm:$0xff]  ;;  %v271_v16 = vld [vmem:[%s3611_s5 + $0x18] sm:$0xff]  ;;  %s2949_s5 = smov 112  }
   0x6   :  { %2663 = vmatprep.subr.bf16.mxu1 %v2662_v6  ;;  %v2670_v15 = vpack.c.bf16 %v269_v13, %v268_v12  ;;  %v2674_v17 = vpack.c.bf16 %v271_v16, %v270_v14  ;;  %v2331_v18 = vld [vmem:[%s3612_s3] ss:$0 sm:$0xff]  ;;  %s2948_s3 = smov 120  }
   0x7   :  { %2665 = vmatpush3.bf16.msra.mxu1 %v2662_v6 }
   0x8   :  { %2504 = vmatmul.mubr.msk.f32.gmra.mrb[2].mxu1 %vm59_vm1, %v50_v7  ;;  %2667 = vmatprep.subr.bf16.mxu1 %v2666_v10 }
   0x9   :  { %2671 = vmatprep.subr.bf16.mxu0 %v2670_v15 }
   0xa   :  { %2673 = vmatpush3.bf16.msra.mxu0 %v2670_v15 }
   0xb   :  { %2669 = vmatpush3.bf16.msra.mxu1 %v2666_v10  ;;  %2675 = vmatprep.subr.bf16.mxu0 %v2674_v17 }
   0xc   :  { %2514 = vmatprep.subr.mxu1 %v169_v11 }
   0xe   :  { %2677 = vmatpush3.bf16.msra.mxu0 %v2674_v17 }
   0xf   :  { %2515 = vmatpush3.msra.mxu1 %v169_v11 }
  0xd7   :  { %v2502_v19 = vpop.f32.mrb[0].mxu1 }
  0xd8   :  { %v148_v20 = vadd.f32 %v2502_v19, %v2331_v18  ;;  %v142_v21 = vpop.f32.mrb[1].mxu1 }
  0xd9   :  { %v143_v22 = vadd.f32 %v2331_v18, %v142_v21 }
  0xda   :  { %v162_v25 = vmax.f32 %v148_v20, 0.0 }
  0xdb   :  { %v161_v23 = vmax.f32 %v143_v22, 0.0  ;;  %v2505_v24 = vpop.f32.mrb[2].mxu1 }
  0xdc   :  { %v158_v26 = vadd.f32 %v2505_v24, %v2331_v18  ;;  %v152_v27 = vpop.f32.mrb[3].mxu1 }
  0xdd   :  { %2516 = vmatprep.mubr.msk.f32.mxu1 %vm170_vm2, %v161_v23  ;;  %v153_v28 = vadd.f32 %v2331_v18, %v152_v27  ;;  %v45_v27 = vld [vmem:[%s3613_s1] sm:$0xff]  ;;  %s2959_s1 = smov 8  }
  0xde   :  { %v164_v29 = vmax.f32 %v158_v26, 0.0  ;;  %2517 = vmatmul.mubr.msk.f32.vlgmr.msra.gmra.mrb[4].mxu1 %vm170_vm2, %v162_v25  ;;  %vm46_vm4 = vnez %v45_v27 }
  0xdf   :  { %v163_v30 = vmax.f32 %v153_v28, 0.0  ;;  %v454_v28 = vsel %vm46_vm4, 16843009, %v2952_v40 }
  0xe1   :  { %2519 = vmatprep.mubr.msk.f32.mxu1 %vm170_vm2, %v163_v30  ;;  %v455_v30 = vunpack.c.0.s8 %v454_v28 }
  0xe2   :  { %2520 = vmatmul.mubr.msk.f32.gmra.mrb[6].mxu1 %vm170_vm2, %v164_v29  ;;  %v456_v29 = vunpack.c.1.s8 %v454_v28 }
 0x1b1   :  { %v2518_v31 = vpop.f32.mrb[4].mxu1 }
 0x1b2   :  { %v249_v32 = vpop.f32.mrb[5].mxu1 }
 0x1b3   :  { %2530 = vmatprep.mubr.msk.f32.mxu0 %vm272_vm3, %v249_v32  ;;  %v2764_v33 = vpack.i.bf16 %v2518_v31, %v249_v32  ;;  %v2678_v34 = vpack.c.bf16 %v2518_v31, %v249_v32  ;;  %v461_v32 = vpack.c.b16 %v456_v29, %v456_v29 }
 0x1b4   :  { %2531 = vmatmul.mubr.msk.f32.vlgmr.msra.gmra.mrb[0].mxu0 %vm272_vm3, %v2518_v31  ;;  %v457_v31 = vunpack.c.2.s8 %v454_v28 }
 0x1b5   :  { %2765 = vrot.lane.b32.xlu1 %v2764_v33, %s2948_s3  ;;  %2679 = vmatprep.subr.bf16.mxu0 %v2678_v34  ;;  %v2521_v35 = vpop.f32.mrb[6].mxu1 }
 0x1b6   :  { %2681 = vmatpush3.bf16.msra.mxu0 %v2678_v34  ;;  %v259_v36 = vpop.f32.mrb[7].mxu1  ;;  %v434_v34 = vlaneseq }
 0x1b7   :  { %v3083_v37 = vpack.i.bf16 %v2521_v35, %v259_v36  ;;  %2533 = vmatprep.mubr.msk.f32.mxu0 %vm272_vm3, %v259_v36  ;;  %v2682_v38 = vpack.c.bf16 %v2521_v35, %v259_v36 }
 0x1b8   :  { %2534 = vmatmul.mubr.msk.f32.gmra.mrb[2].mxu0 %vm272_vm3, %v2521_v35  ;;  %v463_v35 = vpack.c.b16 %v457_v31, %v457_v31 }
 0x1b9   :  { %2770 = vrot.lane.b32.xlu1 %v2764_v33, %s2949_s5  ;;  %2780 = vrot.lane.b32.xlu0 %v3083_v37, %s2948_s3 }
 0x1ba   :  { %2683 = vmatprep.subr.bf16.mxu0 %v2682_v38 }
 0x1bb   :  { %2685 = vmatpush3.bf16.msra.mxu0 %v2682_v38  ;;  %v462_v38 = vpack.c.b8 %v461_v32, %v461_v32 }
 0x1bd   :  { %2775 = vrot.lane.b32.xlu1 %v2764_v33, %s2950_s30  ;;  %v459_v33 = vpack.c.b16 %v455_v30, %v455_v30  ;;  %vm468_vm5 = vnez %v462_v38 }
 0x227   :  { %v2766_v41 = vpop.permute.xlu1 %2765 }
 0x228   :  { %v2768_v42 = vunpack.i.h.bf16 %v2766_v41  ;;  %v2767_v43 = vunpack.i.l.bf16 %v2766_v41  ;;  %v435_v41 = vshrl.u32 %v434_v34, 7 }
 0x22a   :  { %v2686_v44 = vpack.c.bf16 %v2768_v42, %v2767_v43  ;;  %v464_v42 = vpack.c.b8 %v463_v35, %v463_v35 }
 0x22b   :  { %v2771_v45 = vpop.permute.xlu1 %2770  ;;  %v2781_v46 = vpop.permute.xlu0 %2780 }
 0x22c   :  { %v2773_v47 = vunpack.i.h.bf16 %v2771_v45  ;;  %v2772_v48 = vunpack.i.l.bf16 %v2771_v45  ;;  %2687 = vmatprep.subr.bf16.mxu1 %v2686_v44  ;;  %v2783_v49 = vunpack.i.h.bf16 %v2781_v46  ;;  %v2782_v50 = vunpack.i.l.bf16 %v2781_v46 }
 0x22d   :  { %2689 = vmatpush3.bf16.msra.mxu1 %v2686_v44  ;;  %v3150_v44 = vsub.s32 0, %v435_v41  ;;  %v472_v45 = vsel %vm468_vm5, 16843009, %v2952_v40  ;;  %vm469_vm7 = vnez %v464_v42 }
 0x22e   :  { %v3092_v51 = vpack.c.bf16 %v2773_v47, %v2772_v48  ;;  %v2690_v52 = vpack.c.bf16 %v2783_v49, %v2782_v50  ;;  %v476_v48 = vunpack.c.0.s8 %v472_v45  ;;  %v473_v50 = vsel %vm469_vm7, 16843009, %v2952_v40 }
 0x22f   :  { %v2776_v53 = vpop.permute.xlu1 %2775 }
 0x230   :  { %v2778_v54 = vunpack.i.h.bf16 %v2776_v53  ;;  %v2777_v55 = vunpack.i.l.bf16 %v2776_v53  ;;  %2695 = vmatprep.subr.bf16.mxu0 %v3092_v51  ;;  %2691 = vmatprep.subr.bf16.mxu1 %v2690_v52  ;;  %vm3157_vm8 = vcmp.ne.s32.totalorder %v476_v48, 0 }
 0x231   :  { %2693 = vmatpush3.bf16.msra.mxu1 %v2690_v52 }
 0x232   :  { %v3095_v56 = vpack.c.bf16 %v2778_v54, %v2777_v55 }
 0x234   :  { %2703 = vmatprep.subr.bf16.mxu1 %v3095_v56 }
 0x287   :  { %v2532_v57 = vpop.f32.mrb[0].mxu0 }
 0x288   :  { %376 = vrot.lane.b32.xlu1 %v2532_v57, %s2953_s2  ;;  %v351_v58 = vpop.f32.mrb[1].mxu0  ;;  %963 = vrot.lane.b32.xlu0 %v2532_v57, %s2954_s13 }
 0x28b   :  { %v2535_v59 = vpop.f32.mrb[2].mxu0 }
 0x28c   :  { %678 = vrot.lane.b32.xlu1 %v2532_v57, %s2955_s14  ;;  %725 = vperm.xlu0 %2785, %v2532_v57   ;;  %v361_v60 = vpop.f32.mrb[3].mxu0 }
 0x290   :  { %1248 = vrot.lane.b32.xlu1 %v2532_v57, %s2956_s15  ;;  %2787 = vset.pattern.permute.xlu0 %v2957_v61 }
 0x291   :  { %1295 = vperm.xlu0 %2787, %v2532_v57  }
 0x294   :  { %423 = vperm.xlu1 %2784, %v2532_v57  }
 0x295   :  { %374 = vrot.lane.b32.xlu0 %v351_v58, %s2953_s2 }
 0x296   :  { %2788 = vset.pattern.permute.xlu0 %v2952_v40 }
 0x298   :  { %2786 = vset.pattern.permute.xlu1 %v2958_v62 }
 0x299   :  { %1010 = vperm.xlu1 %2786, %v2532_v57   ;;  %676 = vrot.lane.b32.xlu0 %v351_v58, %s2955_s14 }
 0x29d   :  { %1246 = vrot.lane.b32.xlu1 %v351_v58, %s2956_s15  ;;  %961 = vrot.lane.b32.xlu0 %v351_v58, %s2954_s13 }
 0x29e   :  { %2789 = vset.pattern.permute.xlu1 %v2951_v39 }
 0x2a1   :  { %721 = vperm.xlu1 %2789, %v351_v58   ;;  %419 = vperm.xlu0 %2788, %v351_v58  }
 0x2a5   :  { %2791 = vset.pattern.permute.xlu1 %v2957_v61  ;;  %2790 = vset.pattern.permute.xlu0 %v2958_v62 }
 0x2a6   :  { %1291 = vperm.xlu1 %2791, %v351_v58   ;;  %1006 = vperm.xlu0 %2790, %v351_v58   ;;  %v477_v58 = vunpack.c.0.s8 %v473_v50 }
 0x2a8   :  { %vm3169_vm13 = vcmp.ne.s32.totalorder %v477_v58, 0 }
 0x2aa   :  { %682 = vrot.lane.b32.xlu1 %v2535_v59, %s2955_s14  ;;  %380 = vrot.lane.b32.xlu0 %v2535_v59, %s2953_s2 }
 0x2ab   :  { %2792 = vset.pattern.permute.xlu1 %v2952_v40  ;;  %2797 = vset.pattern.permute.xlu0 %v2951_v39 }
 0x2ae   :  { %1252 = vrot.lane.b32.xlu1 %v2535_v59, %s2956_s15  ;;  %967 = vrot.lane.b32.xlu0 %v2535_v59, %s2954_s13 }
 0x2b2   :  { %431 = vperm.xlu1 %2792, %v2535_v59   ;;  %378 = vrot.lane.b32.xlu0 %v361_v60, %s2953_s2 }
 0x2b6   :  { %2793 = vset.pattern.permute.xlu1 %v2951_v39  ;;  %965 = vrot.lane.b32.xlu0 %v361_v60, %s2954_s13  ;;  %v460_v39 = vpack.c.b8 %v459_v33, %v459_v33 }
 0x2b7   :  { %733 = vperm.xlu1 %2793, %v2535_v59  }
 0x2b8   :  { %vm467_vm6 = vnez %v460_v39 }
 0x2b9   :  { %v471_v46 = vsel %vm467_vm6, 16843009, %v2952_v40 }
 0x2ba   :  { %729 = vperm.xlu0 %2797, %v361_v60   ;;  %v475_v49 = vunpack.c.0.s8 %v471_v46 }
 0x2bb   :  { %2794 = vset.pattern.permute.xlu1 %v2958_v62 }
 0x2bc   :  { %1018 = vperm.xlu1 %2794, %v2535_v59   ;;  %vm3161_vm9 = vcmp.ne.s32.totalorder %v475_v49, 0 }
 0x2be   :  { %2799 = vset.pattern.permute.xlu0 %v2957_v61 }
 0x2bf   :  { %1299 = vperm.xlu0 %2799, %v361_v60  }
 0x2c0   :  { %2795 = vset.pattern.permute.xlu1 %v2957_v61 }
 0x2c1   :  { %1303 = vperm.xlu1 %2795, %v2535_v59  }
 0x2c5   :  { %680 = vrot.lane.b32.xlu1 %v361_v60, %s2955_s14 }
 0x2c6   :  { %2796 = vset.pattern.permute.xlu1 %v2952_v40 }
 0x2c9   :  { %1250 = vrot.lane.b32.xlu1 %v361_v60, %s2956_s15 }
 0x2cd   :  { %427 = vperm.xlu1 %2796, %v361_v60  }
 0x2d1   :  { %2798 = vset.pattern.permute.xlu1 %v2958_v62 }
 0x2d2   :  { %1014 = vperm.xlu1 %2798, %v361_v60  }
 0x2fa   :  { %v377_v63 = vpop.permute.xlu1 %376  ;;  %v964_v0 = vpop.permute.xlu0 %963 }
 0x2fe   :  { %v679_v1 = vpop.permute.xlu1 %678 }
 0x302   :  { %v1249_v3 = vpop.permute.xlu1 %1248 }
 0x30b   :  { %v3120_v2 = vpop.permute.xlu0 %725 }
 0x310   :  { %v3122_v4 = vpop.permute.xlu0 %1295 }
 0x313   :  { %v3124_v5 = vpop.permute.xlu1 %423 }
 0x314   :  { %v375_v6 = vpop.permute.xlu0 %374 }
 0x315   :  { %386 = vxpose.xlu0.b32.start [1/4] (short) (narrow) %v375_v6, 8 }
 0x318   :  { %v3126_v7 = vpop.permute.xlu1 %1010  ;;  %v677_v8 = vpop.permute.xlu0 %676 }
 0x319   :  { %688 = vxpose.xlu1.b32.start [1/4] (short) (narrow) %v677_v8, 8  ;;  %387 = vxpose.xlu0.b32.cont [2/4] (short) (narrow) %v377_v63, 8 }
 0x31c   :  { %v1247_v9 = vpop.permute.xlu1 %1246  ;;  %v962_v10 = vpop.permute.xlu0 %961 }
 0x31d   :  { %689 = vxpose.xlu1.b32.cont [2/4] (short) (narrow) %v679_v1, 8 }
 0x320   :  { %v3128_v11 = vpop.permute.xlu1 %721  ;;  %v420_v12 = vpop.permute.xlu0 %419 }
 0x325   :  { %v3130_v13 = vpop.permute.xlu1 %1291  ;;  %v3132_v14 = vpop.permute.xlu0 %1006 }
 0x329   :  { %v683_v15 = vpop.permute.xlu1 %682  ;;  %v381_v16 = vpop.permute.xlu0 %380 }
 0x32d   :  { %v1253_v17 = vpop.permute.xlu1 %1252  ;;  %v968_v18 = vpop.permute.xlu0 %967 }
 0x331   :  { %v3134_v19 = vpop.permute.xlu1 %431  ;;  %v379_v20 = vpop.permute.xlu0 %378 }
 0x332   :  { %388 = vxpose.xlu0.b32.cont [3/4] (short) (narrow) %v379_v20, 8 }
 0x335   :  { %v966_v24 = vpop.permute.xlu0 %965 }
 0x336   :  { %v3136_v21 = vpop.permute.xlu1 %733  ;;  %389 = vxpose.xlu0.b32.end [4/4] (short) (narrow) %v381_v16, 8 }
 0x339   :  { %v730_v36 = vpop.permute.xlu0 %729 }
 0x33a   :  { %973 = vxpose.xlu0.b32.start [1/4] (short) (narrow) %v962_v10, 8 }
 0x33b   :  { %v3138_v22 = vpop.permute.xlu1 %1018 }
 0x33e   :  { %974 = vxpose.xlu0.b32.cont [2/4] (short) (narrow) %v964_v0, 8  ;;  %v3148_v43 = vpop.permute.xlu0 %1299  ;;  %v458_v0 = vunpack.c.3.s8 %v454_v28 }
 0x340   :  { %v3140_v23 = vpop.permute.xlu1 %1303  ;;  %v465_v16 = vpack.c.b16 %v458_v0, %v458_v0 }
 0x342   :  { %975 = vxpose.xlu0.b32.cont [3/4] (short) (narrow) %v966_v24, 8 }
 0x344   :  { %v681_v25 = vpop.permute.xlu1 %680 }
 0x345   :  { %690 = vxpose.xlu1.b32.cont [3/4] (short) (narrow) %v681_v25, 8 }
 0x346   :  { %976 = vxpose.xlu0.b32.end [4/4] (short) (narrow) %v968_v18, 8  ;;  %v466_v18 = vpack.c.b8 %v465_v16, %v465_v16 }
 0x348   :  { %v1251_v26 = vpop.permute.xlu1 %1250  ;;  %vm470_vm14 = vnez %v466_v18 }
 0x349   :  { %691 = vxpose.xlu1.b32.end [4/4] (short) (narrow) %v683_v15, 8  ;;  %v474_v30 = vsel %vm470_vm14, 16843009, %v2952_v40 }
 0x34c   :  { %v428_v53 = vpop.permute.xlu1 %427 }
 0x34d   :  { %1258 = vxpose.xlu1.b32.start [1/4] (short) (narrow) %v1247_v9, 8 }
 0x351   :  { %1259 = vxpose.xlu1.b32.cont [2/4] (short) (narrow) %v1249_v3, 8  ;;  %v1015_v20 = vpop.permute.xlu1 %1014 }
 0x355   :  { %1260 = vxpose.xlu1.b32.cont [3/4] (short) (narrow) %v1251_v26, 8 }
 0x359   :  { %1261 = vxpose.xlu1.b32.end [4/4] (short) (narrow) %v1253_v17, 8 }
 0x36f   :  { %2810 = vset.pattern.permute.xlu0 %v2952_v40 }
 0x377   :  { %2811 = vset.pattern.permute.xlu1 %v2952_v40 }
 0x3aa   :  { %v402_v47 = vpop.trf.xlu0 }
 0x3ab   :  { %v437_v52 = vrot.slane %v402_v47, %v3150_v44 }
 0x3ad   :  { %v439_v54 = vadd.f32 %v437_v52, %v3124_v5  ;;  %v438_v55 = vadd.f32 %v437_v52, %v420_v12  ;;  %v440_v57 = vadd.f32 %v437_v52, %v428_v53  ;;  %v441_v29 = vadd.f32 %v437_v52, %v3134_v19  ;;  %v2075_v5 = vld [vmem:[%s3616_s8 + $0x8] sm:$0xff]  ;;  %v2077_v53 = vld [vmem:[%s3616_s8 + $0x18] sm:$0xff] }
 0x3af   :  { %vm443_vm10 = vcmp.gt.f32.partialorder %v439_v54, 0.0  ;;  %v447_v61 = vmul.f32 0.2, %v439_v54  ;;  %vm442_vm11 = vcmp.gt.f32.partialorder %v438_v55, 0.0  ;;  %v446_v62 = vmul.f32 0.2, %v438_v55 }
 0x3b0   :  { %vm444_vm12 = vcmp.gt.f32.partialorder %v440_v57, 0.0  ;;  %v448_v63 = vmul.f32 0.2, %v440_v57  ;;  %vm445_vm5 = vcmp.gt.f32.partialorder %v441_v29, 0.0 }
 0x3b1   :  { %v3165_v1 = vsel %vm443_vm10, %v439_v54, %v447_v61  ;;  %v3167_v3 = vsel %vm442_vm11, %v438_v55, %v446_v62 }
 0x3b2   :  { %v484_v6 = vsel %vm3157_vm8, %v3165_v1, 3e+38  ;;  %v483_v8 = vsel %vm3161_vm9, %v3167_v3, 3e+38  ;;  %v3179_v9 = vsel %vm444_vm12, %v440_v57, %v448_v63 }
 0x3b3   :  { %v490_v10 = vsel %vm272_vm3, %v484_v6, inf  ;;  %v487_v12 = vsel %vm272_vm3, %v483_v8, inf  ;;  %v485_v15 = vsel %vm3169_vm13, %v3179_v9, 3e+38 }
 0x3b4   :  { %491 = vmin.xlane.f32.xlu1 %v490_v10  ;;  %488 = vmin.xlane.f32.xlu0 %v487_v12  ;;  %v493_v17 = vsel %vm272_vm3, %v485_v15, inf }
 0x3b8   :  { %494 = vmin.xlane.f32.xlu1 %v493_v17 }
 0x3ba   :  { %v989_v24 = vpop.trf.xlu0 }
 0x3bb   :  { %v1024_v25 = vrot.slane %v989_v24, %v3150_v44 }
 0x3bd   :  { %v704_v26 = vpop.trf.xlu1  ;;  %v1025_v27 = vadd.f32 %v1024_v25, %v3132_v14  ;;  %v478_v14 = vunpack.c.0.s8 %v474_v30  ;;  %v1026_v50 = vadd.f32 %v1024_v25, %v3126_v7  ;;  %v1027_v61 = vadd.f32 %v1024_v25, %v1015_v20 }
 0x3be   :  { %v739_v28 = vrot.slane %v704_v26, %v3150_v44  ;;  %v1028_v12 = vadd.f32 %v1024_v25, %v3138_v22 }
 0x3bf   :  { %v1033_v34 = vmul.f32 0.2, %v1025_v27  ;;  %vm1029_vm15 = vcmp.gt.f32.partialorder %v1025_v27, 0.0  ;;  %vm3220_vm6 = vcmp.ne.s32.totalorder %v478_v14, 0  ;;  %v1034_v7 = vmul.f32 0.2, %v1026_v50 }
 0x3c0   :  { %v742_v31 = vadd.f32 %v739_v28, %v730_v36  ;;  %v740_v32 = vadd.f32 %v739_v28, %v3128_v11  ;;  %v741_v33 = vadd.f32 %v739_v28, %v3120_v2  ;;  %v743_v41 = vadd.f32 %v739_v28, %v3136_v21 }
 0x3c1   :  { %v3199_v40 = vsel %vm1029_vm15, %v1025_v27, %v1033_v34  ;;  %v449_v11 = vmul.f32 0.2, %v441_v29  ;;  %vm1030_vm10 = vcmp.gt.f32.partialorder %v1026_v50, 0.0  ;;  %v1035_v10 = vmul.f32 0.2, %v1027_v61 }
 0x3c2   :  { %vm746_vm0 = vcmp.gt.f32.partialorder %v742_v31, 0.0  ;;  %v750_v35 = vmul.f32 0.2, %v742_v31  ;;  %vm744_vm1 = vcmp.gt.f32.partialorder %v740_v32, 0.0  ;;  %v748_v38 = vmul.f32 0.2, %v740_v32 }
 0x3c3   :  { %vm745_vm4 = vcmp.gt.f32.partialorder %v741_v33, 0.0  ;;  %v749_v39 = vmul.f32 0.2, %v741_v33  ;;  %v1041_v48 = vsel %vm3161_vm9, %v3199_v40, 3e+38  ;;  %v3218_v52 = vsel %vm445_vm5, %v441_v29, %v449_v11 }
 0x3c4   :  { %v3195_v42 = vsel %vm746_vm0, %v742_v31, %v750_v35  ;;  %v3197_v19 = vsel %vm744_vm1, %v740_v32, %v748_v38  ;;  %v751_v49 = vmul.f32 0.2, %v743_v41  ;;  %vm747_vm7 = vcmp.gt.f32.partialorder %v743_v41, 0.0 }
 0x3c5   :  { %v758_v2 = vsel %vm3169_vm13, %v3195_v42, 3e+38  ;;  %v756_v36 = vsel %vm3161_vm9, %v3197_v19, 3e+38  ;;  %v3207_v45 = vsel %vm745_vm4, %v741_v33, %v749_v39  ;;  %v1045_v55 = vsel %vm272_vm3, %v1041_v48, inf }
 0x3c6   :  { %v766_v21 = vsel %vm272_vm3, %v758_v2, inf  ;;  %v760_v46 = vsel %vm272_vm3, %v756_v36, inf  ;;  %v757_v47 = vsel %vm3157_vm8, %v3207_v45, 3e+38  ;;  %v486_v57 = vsel %vm3220_vm6, %v3218_v52, 3e+38 }
 0x3c7   :  { %767 = vmin.xlane.f32.xlu1 %v766_v21  ;;  %761 = vmin.xlane.f32.xlu0 %v760_v46  ;;  %v763_v54 = vsel %vm272_vm3, %v757_v47, inf  ;;  %v3229_v58 = vsel %vm747_vm7, %v743_v41, %v751_v49  ;;  %v496_v0 = vsel %vm272_vm3, %v486_v57, inf  ;;  %v3236_v8 = vsel %vm1030_vm10, %v1026_v50, %v1034_v7 }
 0x3c8   :  { %v759_v6 = vsel %vm3220_vm6, %v3229_v58, 3e+38  ;;  %vm1031_vm11 = vcmp.gt.f32.partialorder %v1027_v61, 0.0  ;;  %v1042_v26 = vsel %vm3157_vm8, %v3236_v8, 3e+38  ;;  %vm1032_vm15 = vcmp.gt.f32.partialorder %v1028_v12, 0.0 }
 0x3c9   :  { %v769_v18 = vsel %vm272_vm3, %v759_v6, inf  ;;  %v3246_v27 = vsel %vm1031_vm11, %v1027_v61, %v1035_v10  ;;  %v1036_v22 = vmul.f32 0.2, %v1028_v12  ;;  %v1048_v29 = vsel %vm272_vm3, %v1042_v26, inf }
 0x3cb   :  { %764 = vmin.xlane.f32.xlu0 %v763_v54  ;;  %1046 = vmin.xlane.f32.xlu1 %v1045_v55  ;;  %v3264_v32 = vsel %vm1032_vm15, %v1028_v12, %v1036_v22 }
 0x3cc   :  { %v1044_v39 = vsel %vm3220_vm6, %v3264_v32, 3e+38 }
 0x3cd   :  { %v1274_v62 = vpop.trf.xlu1  ;;  %v1054_v11 = vsel %vm272_vm3, %v1044_v39, inf }
 0x3ce   :  { %v1309_v63 = vrot.slane %v1274_v62, %v3150_v44 }
 0x3cf   :  { %497 = vmin.xlane.f32.xlu0 %v496_v0 }
 0x3d0   :  { %v1310_v15 = vadd.f32 %v1309_v63, %v3130_v13  ;;  %v1311_v16 = vadd.f32 %v1309_v63, %v3122_v4  ;;  %v1312_v17 = vadd.f32 %v1309_v63, %v3148_v43  ;;  %v1313_v43 = vadd.f32 %v1309_v63, %v3140_v23 }
 0x3d1   :  { %v1043_v23 = vsel %vm3169_vm13, %v3246_v27, 3e+38 }
 0x3d2   :  { %vm1314_vm12 = vcmp.gt.f32.partialorder %v1310_v15, 0.0  ;;  %v1318_v20 = vmul.f32 0.2, %v1310_v15  ;;  %vm1315_vm14 = vcmp.gt.f32.partialorder %v1311_v16, 0.0  ;;  %v1319_v24 = vmul.f32 0.2, %v1311_v16 }
 0x3d3   :  { %770 = vmin.xlane.f32.xlu0 %v769_v18  ;;  %v1320_v25 = vmul.f32 0.2, %v1312_v17  ;;  %vm1316_vm0 = vcmp.gt.f32.partialorder %v1312_v17, 0.0  ;;  %v1321_v34 = vmul.f32 0.2, %v1313_v43  ;;  %vm1317_vm1 = vcmp.gt.f32.partialorder %v1313_v43, 0.0 }
 0x3d4   :  { %v3248_v13 = vsel %vm1314_vm12, %v1310_v15, %v1318_v20  ;;  %v3250_v4 = vsel %vm1315_vm14, %v1311_v16, %v1319_v24  ;;  %v1051_v38 = vsel %vm272_vm3, %v1043_v23, inf }
 0x3d5   :  { %v1326_v28 = vsel %vm3161_vm9, %v3248_v13, 3e+38  ;;  %v1327_v31 = vsel %vm3157_vm8, %v3250_v4, 3e+38  ;;  %v3266_v33 = vsel %vm1316_vm0, %v1312_v17, %v1320_v25  ;;  %v3276_v41 = vsel %vm1317_vm1, %v1313_v43, %v1321_v34 }
 0x3d6   :  { %v1330_v30 = vsel %vm272_vm3, %v1326_v28, inf  ;;  %v1333_v35 = vsel %vm272_vm3, %v1327_v31, inf  ;;  %v1328_v14 = vsel %vm3169_vm13, %v3266_v33, 3e+38  ;;  %v1329_v36 = vsel %vm3220_vm6, %v3276_v41, 3e+38 }
 0x3d7   :  { %1049 = vmin.xlane.f32.xlu0 %v1048_v29  ;;  %1331 = vmin.xlane.f32.xlu1 %v1330_v30  ;;  %v1336_v2 = vsel %vm272_vm3, %v1328_v14, inf  ;;  %v1339_v21 = vsel %vm272_vm3, %v1329_v36, inf }
 0x3db   :  { %1334 = vmin.xlane.f32.xlu0 %v1333_v35  ;;  %1052 = vmin.xlane.f32.xlu1 %v1051_v38 }
 0x3df   :  { %1055 = vmin.xlane.f32.xlu0 %v1054_v11  ;;  %1337 = vmin.xlane.f32.xlu1 %v1336_v2 }
 0x3e3   :  { %1340 = vmin.xlane.f32.xlu0 %v1339_v21 }
 0x3f0   :  { %2806 = vrot.lane.b32.xlu1 %v3083_v37, %s2950_s30 }
 0x3f9   :  { %2801 = vrot.lane.b32.xlu0 %v3083_v37, %s2949_s5 }
 0x441   :  { %v492_v46 = vpop.xlane.xlu1 %491  ;;  %v489_v47 = vpop.xlane.xlu0 %488 }
 0x442   :  { %v500_v48 = vsub.f32 %v492_v46, %v3165_v1  ;;  %v499_v49 = vsub.f32 %v489_v47, %v3167_v3 }
 0x444   :  { %v504_v50 = vmin.f32 %v500_v48, 0.0  ;;  %v503_v54 = vmin.f32 %v499_v49, 0.0 }
 0x445   :  { %v495_v55 = vpop.xlane.xlu1 %494 }
 0x446   :  { %v509_v57 = vmul.f32 1.442695, %v504_v50  ;;  %v507_v7 = vmul.f32 1.442695, %v503_v54  ;;  %v501_v61 = vsub.f32 %v495_v55, %v3179_v9 }
 0x448   :  { %2812 = vpow2.f32 %v509_v57  ;;  %v505_v62 = vmin.f32 %v501_v61, 0.0 }
 0x449   :  { %2814 = vpow2.f32 %v507_v7 }
 0x44a   :  { %v511_v63 = vmul.f32 1.442695, %v505_v62 }
 0x44c   :  { %2816 = vpow2.f32 %v511_v63 }
 0x452   :  { %v2813_v0 = vpop.eup %2812 }
 0x453   :  { %v2815_v37 = vpop.eup %2814  ;;  %v3293_v6 = vsel %vm3157_vm8, %v2813_v0, 0.0 }
 0x454   :  { %v768_v1 = vpop.xlane.xlu1 %767  ;;  %v3297_v3 = vsel %vm3161_vm9, %v2815_v37, 0.0  ;;  %v762_v10 = vpop.xlane.xlu0 %761 }
 0x455   :  { %v774_v12 = vsub.f32 %v768_v1, %v3195_v42  ;;  %2544 = vmatprep.mubr.msk.f32.mxu0 %vm272_vm3, %v3297_v3  ;;  %v772_v9 = vsub.f32 %v762_v10, %v3197_v19 }
 0x456   :  { %v2817_v15 = vpop.eup %2816  ;;  %2545 = vmatmul.mubr.msk.f32.vlgmr.msra.gmra.mrb[4].mxu0 %vm272_vm3, %v3293_v6 }
 0x457   :  { %v778_v16 = vmin.f32 %v774_v12, 0.0  ;;  %v776_v17 = vmin.f32 %v772_v9, 0.0  ;;  %2697 = vmatpush3.bf16.msra.mxu0 %v3092_v51  ;;  %v3308_v18 = vsel %vm3169_vm13, %v2817_v15, 0.0 }
 0x458   :  { %v1047_v20 = vpop.xlane.xlu1 %1046  ;;  %2547 = vmatprep.mubr.msk.f32.mxu0 %vm272_vm3, %v3308_v18  ;;  %v765_v42 = vpop.xlane.xlu0 %764 }
 0x459   :  { %v780_v24 = vmul.f32 1.442695, %v776_v17  ;;  %v1057_v19 = vsub.f32 %v1047_v20, %v3199_v40  ;;  %v773_v26 = vsub.f32 %v765_v42, %v3207_v45  ;;  %v784_v22 = vmul.f32 1.442695, %v778_v16 }
 0x45b   :  { %v1061_v25 = vmin.f32 %v1057_v19, 0.0  ;;  %v777_v43 = vmin.f32 %v773_v26, 0.0  ;;  %2818 = vpow2.f32 %v780_v24 }
 0x45c   :  { %v498_v28 = vpop.xlane.xlu0 %497  ;;  %2820 = vpow2.f32 %v784_v22 }
 0x45d   :  { %v1065_v51 = vmul.f32 1.442695, %v1061_v25  ;;  %v782_v29 = vmul.f32 1.442695, %v777_v43  ;;  %v502_v30 = vsub.f32 %v498_v28, %v3218_v52 }
 0x45f   :  { %2822 = vpow2.f32 %v1065_v51  ;;  %v506_v31 = vmin.f32 %v502_v30, 0.0 }
 0x460   :  { %2824 = vpow2.f32 %v782_v29  ;;  %v771_v23 = vpop.xlane.xlu0 %770 }
 0x461   :  { %v513_v34 = vmul.f32 1.442695, %v506_v31  ;;  %v775_v35 = vsub.f32 %v771_v23, %v3229_v58 }
 0x463   :  { %2826 = vpow2.f32 %v513_v34  ;;  %v779_v40 = vmin.f32 %v775_v35, 0.0 }
 0x464   :  { %v1332_v45 = vpop.xlane.xlu1 %1331  ;;  %v1050_v38 = vpop.xlane.xlu0 %1049 }
 0x465   :  { %v786_v39 = vmul.f32 1.442695, %v779_v40  ;;  %v1342_v14 = vsub.f32 %v1332_v45, %v3248_v13  ;;  %v1058_v11 = vsub.f32 %v1050_v38, %v3236_v8  ;;  %v2819_v2 = vpop.eup %2818 }
 0x466   :  { %v788_v21 = vsel %vm3161_vm9, %v2819_v2, 0.0  ;;  %v2821_v46 = vpop.eup %2820 }
 0x467   :  { %2828 = vpow2.f32 %v786_v39  ;;  %v1346_v52 = vmin.f32 %v1342_v14, 0.0  ;;  %v1062_v36 = vmin.f32 %v1058_v11, 0.0  ;;  %2558 = vmatprep.mubr.msk.f32.mxu1 %vm272_vm3, %v788_v21  ;;  %v792_v47 = vsel %vm272_vm3, %v788_v21, 0.0 }
 0x468   :  { %v1053_v58 = vpop.xlane.xlu1 %1052  ;;  %v1335_v48 = vpop.xlane.xlu0 %1334  ;;  %793 = vadd.xlane.f32.xlu0 %v792_v47 }
 0x469   :  { %v2823_v49 = vpop.eup %2822  ;;  %v1350_v50 = vmul.f32 1.442695, %v1346_v52  ;;  %v1067_v54 = vmul.f32 1.442695, %v1062_v36  ;;  %v1059_v13 = vsub.f32 %v1053_v58, %v3246_v27  ;;  %v1343_v8 = vsub.f32 %v1335_v48, %v3250_v4 }
 0x46a   :  { %v2825_v55 = vpop.eup %2824  ;;  %v1073_v57 = vsel %vm3161_vm9, %v2823_v49, 0.0  ;;  %v790_v27 = vsel %vm3169_vm13, %v2821_v46, 0.0 }
 0x46b   :  { %2830 = vpow2.f32 %v1350_v50  ;;  %v1063_v7 = vmin.f32 %v1059_v13, 0.0  ;;  %v1347_v61 = vmin.f32 %v1343_v8, 0.0  ;;  %v789_v62 = vsel %vm3157_vm8, %v2825_v55, 0.0 }
 0x46c   :  { %2832 = vpow2.f32 %v1067_v54  ;;  %2559 = vmatmul.mubr.msk.f32.vlgmr.msra.gmra.mrb[8].mxu1 %vm272_vm3, %v789_v62  ;;  %v1338_v63 = vpop.xlane.xlu1 %1337  ;;  %v1077_v0 = vsel %vm272_vm3, %v1073_v57, 0.0  ;;  %v795_v4 = vsel %vm272_vm3, %v789_v62, 0.0  ;;  %v1056_v37 = vpop.xlane.xlu0 %1055  ;;  %v798_v2 = vsel %vm272_vm3, %v790_v27, 0.0 }
 0x46d   :  { %v2827_v1 = vpop.eup %2826  ;;  %v1069_v10 = vmul.f32 1.442695, %v1063_v7  ;;  %v1352_v12 = vmul.f32 1.442695, %v1347_v61  ;;  %2705 = vmatpush3.bf16.msra.mxu1 %v3095_v56  ;;  %v1344_v9 = vsub.f32 %v1338_v63, %v3266_v33  ;;  %1078 = vadd.xlane.f32.xlu0 %v1077_v0  ;;  %v1060_v15 = vsub.f32 %v1056_v37, %v3264_v32 }
 0x46e   :  { %2561 = vmatprep.mubr.msk.f32.mxu1 %vm272_vm3, %v790_v27  ;;  %796 = vadd.xlane.f32.xlu1 %v795_v4  ;;  %v3339_v16 = vsel %vm3220_vm6, %v2827_v1, 0.0  ;;  %v519_v55 = vsel %vm272_vm3, %v3297_v3, 0.0  ;;  %v525_v7 = vsel %vm272_vm3, %v3308_v18, 0.0  ;;  %v522_v61 = vsel %vm272_vm3, %v3293_v6, 0.0 }
 0x46f   :  { %2834 = vpow2.f32 %v1069_v10  ;;  %v1348_v17 = vmin.f32 %v1344_v9, 0.0  ;;  %v1064_v20 = vmin.f32 %v1060_v15, 0.0  ;;  %2548 = vmatmul.mubr.msk.f32.gmra.mrb[6].mxu0 %vm272_vm3, %v3339_v16  ;;  %v528_v62 = vsel %vm272_vm3, %v3339_v16, 0.0 }
 0x470   :  { %2836 = vpow2.f32 %v1352_v12  ;;  %v2807_v56 = vpop.permute.xlu1 %2806  ;;  %2572 = vmatprep.mubr.msk.f32.mxu0 %vm272_vm3, %v1073_v57  ;;  %v1341_v33 = vpop.xlane.xlu0 %1340 }
 0x471   :  { %v2829_v42 = vpop.eup %2828  ;;  %v1354_v32 = vmul.f32 1.442695, %v1348_v17  ;;  %v1071_v24 = vmul.f32 1.442695, %v1064_v20  ;;  %v2809_v19 = vunpack.i.h.bf16 %v2807_v56  ;;  %v2808_v26 = vunpack.i.l.bf16 %v2807_v56 }
 0x472   :  { %v1345_v22 = vsub.f32 %v1341_v33, %v3276_v41  ;;  %v791_v25 = vsel %vm3220_vm6, %v2829_v42, 0.0 }
 0x473   :  { %2838 = vpow2.f32 %v1354_v32  ;;  %v2706_v43 = vpack.c.bf16 %v2809_v19, %v2808_v26  ;;  %2562 = vmatmul.mubr.msk.f32.gmra.mrb[10].mxu1 %vm272_vm3, %v791_v25  ;;  %v801_v48 = vsel %vm272_vm3, %v791_v25, 0.0 }
 0x474   :  { %2840 = vpow2.f32 %v1071_v24  ;;  %v1349_v28 = vmin.f32 %v1345_v22, 0.0  ;;  %v2802_v51 = vpop.permute.xlu0 %2801 }
 0x475   :  { %v2831_v29 = vpop.eup %2830  ;;  %v2804_v30 = vunpack.i.h.bf16 %v2802_v51  ;;  %v2803_v31 = vunpack.i.l.bf16 %v2802_v51  ;;  %2707 = vmatprep.subr.bf16.mxu1 %v2706_v43 }
 0x476   :  { %v2833_v23 = vpop.eup %2832  ;;  %v1356_v34 = vmul.f32 1.442695, %v1349_v28  ;;  %2709 = vmatpush3.bf16.msra.mxu1 %v2706_v43  ;;  %v1358_v41 = vsel %vm3161_vm9, %v2831_v29, 0.0 }
 0x477   :  { %v2698_v35 = vpack.c.bf16 %v2804_v30, %v2803_v31  ;;  %2586 = vmatprep.mubr.msk.f32.mxu1 %vm272_vm3, %v1358_v41  ;;  %v1362_v40 = vsel %vm272_vm3, %v1358_v41, 0.0  ;;  %v1074_v45 = vsel %vm3157_vm8, %v2833_v23, 0.0 }
 0x478   :  { %2842 = vpow2.f32 %v1356_v34  ;;  %1363 = vadd.xlane.f32.xlu1 %v1362_v40  ;;  %v1080_v38 = vsel %vm272_vm3, %v1074_v45, 0.0 }
 0x479   :  { %v2835_v39 = vpop.eup %2834  ;;  %1081 = vadd.xlane.f32.xlu0 %v1080_v38  ;;  %2699 = vmatprep.subr.bf16.mxu0 %v2698_v35 }
 0x47a   :  { %v2837_v14 = vpop.eup %2836  ;;  %2701 = vmatpush3.bf16.msra.mxu0 %v2698_v35  ;;  %v1075_v36 = vsel %vm3169_vm13, %v2835_v39, 0.0 }
 0x47b   :  { %v1359_v11 = vsel %vm3157_vm8, %v2837_v14, 0.0  ;;  %v1083_v47 = vsel %vm272_vm3, %v1075_v36, 0.0 }
 0x47c   :  { %2587 = vmatmul.mubr.msk.f32.vlgmr.msra.gmra.mrb[12].mxu1 %vm272_vm3, %v1359_v11  ;;  %799 = vadd.xlane.f32.xlu1 %v798_v2  ;;  %v1365_v52 = vsel %vm272_vm3, %v1359_v11, 0.0 }
 0x47d   :  { %v2839_v21 = vpop.eup %2838  ;;  %1366 = vadd.xlane.f32.xlu0 %v1365_v52  ;;  %2573 = vmatmul.mubr.msk.f32.vlgmr.msra.gmra.mrb[8].mxu0 %vm272_vm3, %v1074_v45 }
 0x47e   :  { %v2841_v46 = vpop.eup %2840  ;;  %2575 = vmatprep.mubr.msk.f32.mxu0 %vm272_vm3, %v1075_v36  ;;  %v1360_v58 = vsel %vm3169_vm13, %v2839_v21, 0.0 }
 0x47f   :  { %2589 = vmatprep.mubr.msk.f32.mxu1 %vm272_vm3, %v1360_v58  ;;  %v1076_v49 = vsel %vm3220_vm6, %v2841_v46, 0.0  ;;  %v1368_v13 = vsel %vm272_vm3, %v1360_v58, 0.0 }
 0x480   :  { %1084 = vadd.xlane.f32.xlu1 %v1083_v47  ;;  %v1086_v8 = vsel %vm272_vm3, %v1076_v49, 0.0 }
 0x481   :  { %802 = vadd.xlane.f32.xlu0 %v801_v48  ;;  %2576 = vmatmul.mubr.msk.f32.gmra.mrb[10].mxu0 %vm272_vm3, %v1076_v49 }
 0x482   :  { %v2843_v50 = vpop.eup %2842 }
 0x483   :  { %v1361_v54 = vsel %vm3220_vm6, %v2843_v50, 0.0 }
 0x484   :  { %2590 = vmatmul.mubr.msk.f32.gmra.mrb[14].mxu1 %vm272_vm3, %v1361_v54  ;;  %1369 = vadd.xlane.f32.xlu1 %v1368_v13  ;;  %v1371_v57 = vsel %vm272_vm3, %v1361_v54, 0.0 }
 0x485   :  { %1087 = vadd.xlane.f32.xlu0 %v1086_v8 }
 0x488   :  { %520 = vadd.xlane.f32.xlu1 %v519_v55 }
 0x489   :  { %1372 = vadd.xlane.f32.xlu0 %v1371_v57 }
 0x48c   :  { %526 = vadd.xlane.f32.xlu1 %v525_v7 }
 0x48d   :  { %523 = vadd.xlane.f32.xlu0 %v522_v61 }
 0x491   :  { %529 = vadd.xlane.f32.xlu0 %v528_v62 }
 0x4f5   :  { %v794_v63 = vpop.xlane.xlu0 %793 }
 0x4f6   :  { %v804_v1 = vmax.f32 %v794_v63, 1e-30 }
 0x4fa   :  { %v3386_v0 = vpop.xlane.xlu0 %1078 }
 0x4fb   :  { %v797_v27 = vpop.xlane.xlu1 %796  ;;  %v1089_v56 = vmax.f32 %v3386_v0, 1e-30 }
 0x4fc   :  { %v805_v18 = vmax.f32 %v797_v27, 1e-30 }
 0x4fe   :  { %2844 = vrcp.f32 %v805_v18 }
 0x4ff   :  { %2846 = vrcp.f32 %v804_v1 }
 0x505   :  { %v3392_v37 = vpop.xlane.xlu1 %1363 }
 0x506   :  { %v3388_v3 = vpop.xlane.xlu0 %1081  ;;  %v1374_v32 = vmax.f32 %v3392_v37, 1e-30 }
 0x507   :  { %v1090_v26 = vmax.f32 %v3388_v3, 1e-30 }
 0x508   :  { %v2845_v20 = vpop.eup %2844 }
 0x509   :  { %v800_v12 = vpop.xlane.xlu1 %799  ;;  %v2847_v42 = vpop.eup %2846  ;;  %v813_v19 = vmul.f32 %v2845_v20, %v805_v18 }
 0x50a   :  { %v3390_v4 = vpop.xlane.xlu0 %1366  ;;  %v806_v16 = vmax.f32 %v800_v12, 1e-30  ;;  %v812_v22 = vmul.f32 %v2847_v42, %v804_v1 }
 0x50b   :  { %v1375_v24 = vmax.f32 %v3390_v4, 1e-30  ;;  %v817_v29 = vsub.f32 2.0, %v813_v19 }
 0x50c   :  { %v816_v23 = vsub.f32 2.0, %v812_v22 }
 0x50d   :  { %v3398_v17 = vpop.xlane.xlu1 %1084  ;;  %v821_v45 = vmul.f32 %v2845_v20, %v817_v29 }
 0x50e   :  { %v803_v10 = vpop.xlane.xlu0 %802  ;;  %v1091_v30 = vmax.f32 %v3398_v17, 1e-30  ;;  %v820_v39 = vmul.f32 %v2847_v42, %v816_v23 }
 0x50f   :  { %v807_v15 = vmax.f32 %v803_v10, 1e-30 }
 0x511   :  { %2848 = vrcp.f32 %v807_v15  ;;  %v1370_v43 = vpop.xlane.xlu1 %1369 }
 0x512   :  { %2850 = vrcp.f32 %v806_v16  ;;  %v1088_v33 = vpop.xlane.xlu0 %1087  ;;  %v1376_v34 = vmax.f32 %v1370_v43, 1e-30 }
 0x513   :  { %2852 = vrcp.f32 %v1089_v56  ;;  %v1092_v25 = vmax.f32 %v1088_v33, 1e-30 }
 0x514   :  { %2854 = vrcp.f32 %v1374_v32 }
 0x515   :  { %2856 = vrcp.f32 %v1375_v24 }
 0x516   :  { %v1373_v28 = vpop.xlane.xlu0 %1372  ;;  %2858 = vrcp.f32 %v1090_v26 }
 0x517   :  { %2860 = vrcp.f32 %v1092_v25  ;;  %v1377_v41 = vmax.f32 %v1373_v28, 1e-30 }
 0x518   :  { %2862 = vrcp.f32 %v1091_v30 }
 0x519   :  { %2864 = vrcp.f32 %v1376_v34 }
 0x51a   :  { %2866 = vrcp.f32 %v1377_v41 }
 0x51b   :  { %v2849_v51 = vpop.eup %2848 }
 0x51c   :  { %v2851_v31 = vpop.eup %2850  ;;  %v815_v35 = vmul.f32 %v2849_v51, %v807_v15 }
 0x51d   :  { %v814_v40 = vmul.f32 %v2851_v31, %v806_v16  ;;  %v2853_v2 = vpop.eup %2852 }
 0x51e   :  { %v819_v52 = vsub.f32 2.0, %v815_v35  ;;  %v2855_v21 = vpop.eup %2854  ;;  %v1097_v7 = vmul.f32 %v2853_v2, %v1089_v56 }
 0x51f   :  { %v818_v46 = vsub.f32 2.0, %v814_v40  ;;  %v2857_v48 = vpop.eup %2856  ;;  %v1382_v0 = vmul.f32 %v2855_v21, %v1374_v32 }
 0x520   :  { %v2859_v54 = vpop.eup %2858  ;;  %v823_v57 = vmul.f32 %v2849_v51, %v819_v52  ;;  %v1383_v61 = vmul.f32 %v2857_v48, %v1375_v24  ;;  %v1101_v20 = vsub.f32 2.0, %v1097_v7 }
 0x521   :  { %v2861_v8 = vpop.eup %2860  ;;  %v822_v63 = vmul.f32 %v2851_v31, %v818_v46  ;;  %v1098_v3 = vmul.f32 %v2859_v54, %v1090_v26  ;;  %v1386_v56 = vsub.f32 2.0, %v1382_v0 }
 0x522   :  { %v2863_v37 = vpop.eup %2862  ;;  %v1100_v18 = vmul.f32 %v2861_v8, %v1092_v25  ;;  %v1387_v16 = vsub.f32 2.0, %v1383_v61  ;;  %v1105_v29 = vmul.f32 %v2853_v2, %v1101_v20 }
 0x523   :  { %v2865_v10 = vpop.eup %2864  ;;  %v1102_v33 = vsub.f32 2.0, %v1098_v3  ;;  %v1099_v32 = vmul.f32 %v2863_v37, %v1091_v30  ;;  %v1390_v28 = vmul.f32 %v2855_v21, %v1386_v56 }
 0x524   :  { %v2867_v15 = vpop.eup %2866  ;;  %v1384_v24 = vmul.f32 %v2865_v10, %v1376_v34  ;;  %v1104_v19 = vsub.f32 2.0, %v1100_v18  ;;  %v1391_v25 = vmul.f32 %v2857_v48, %v1387_v16 }
 0x525   :  { %v1385_v22 = vmul.f32 %v2867_v15, %v1377_v41  ;;  %v1106_v51 = vmul.f32 %v2859_v54, %v1102_v33  ;;  %v1103_v23 = vsub.f32 2.0, %v1099_v32 }
 0x526   :  { %v1388_v35 = vsub.f32 2.0, %v1384_v24 }
 0x527   :  { %v1389_v34 = vsub.f32 2.0, %v1385_v22  ;;  %v1107_v7 = vmul.f32 %v2863_v37, %v1103_v23 }
 0x529   :  { %v3394_v6 = vpop.f32.mrb[4].mxu0  ;;  %v1393_v3 = vmul.f32 %v2867_v15, %v1389_v34 }
 0x52a   :  { %v3396_v9 = vpop.f32.mrb[5].mxu0 }
 0x53f   :  { %v2560_v38 = vpop.f32.mrb[8].mxu1 }
 0x540   :  { %v3405_v14 = vmul.f32 %v2560_v38, %v821_v45  ;;  %v914_v11 = vpop.f32.mrb[9].mxu1 }
 0x541   :  { %v3407_v36 = vmul.f32 %v914_v11, %v820_v39  ;;  %v1108_v39 = vmul.f32 %v2861_v8, %v1104_v19  ;;  %v1595_v19 = vld [vmem:[%s3614_s6 + $0x8] sm:$0xff] }
 0x542   :  { %v942_v58 = vmin.f32 %v3405_v14, 0.0  ;;  %v3410_v47 = vpop.f32.mrb[6].mxu0  ;;  %vm938_vm4 = vcmp.gt.f32.partialorder %v3405_v14, 0.0 }
 0x543   :  { %v941_v49 = vmin.f32 %v3407_v36, 0.0  ;;  %v3413_v50 = vpop.f32.mrb[7].mxu0  ;;  %vm937_vm5 = vcmp.gt.f32.partialorder %v3407_v36, 0.0 }
 0x544   :  { %v947_v13 = vmul.f32 1.442695, %v942_v58 }
 0x545   :  { %v945_v55 = vmul.f32 1.442695, %v941_v49 }
 0x546   :  { %2868 = vpow2.f32 %v947_v13  ;;  %v2563_v62 = vpop.f32.mrb[10].mxu1 }
 0x547   :  { %2870 = vpow2.f32 %v945_v55  ;;  %v3415_v27 = vmul.f32 %v2563_v62, %v823_v57  ;;  %v924_v4 = vpop.f32.mrb[11].mxu1 }
 0x548   :  { %v3417_v1 = vmul.f32 %v924_v4, %v822_v63 }
 0x549   :  { %v944_v12 = vmin.f32 %v3415_v27, 0.0  ;;  %vm940_vm7 = vcmp.gt.f32.partialorder %v3415_v27, 0.0 }
 0x54a   :  { %v943_v17 = vmin.f32 %v3417_v1, 0.0  ;;  %vm939_vm10 = vcmp.gt.f32.partialorder %v3417_v1, 0.0 }
 0x54b   :  { %v951_v42 = vmul.f32 1.442695, %v944_v12 }
 0x54c   :  { %v949_v26 = vmul.f32 1.442695, %v943_v17 }
 0x54d   :  { %2872 = vpow2.f32 %v951_v42 }
 0x54e   :  { %2874 = vpow2.f32 %v949_v26 }
 0x54f   :  { %v2588_v43 = vpop.f32.mrb[12].mxu1 }
 0x550   :  { %v2869_v31 = vpop.eup %2868  ;;  %v3421_v40 = vmul.f32 %v2588_v43, %v1391_v25  ;;  %v1484_v45 = vpop.f32.mrb[13].mxu1 }
 0x551   :  { %v2574_v38 = vpop.f32.mrb[8].mxu0  ;;  %v2871_v30 = vpop.eup %2870  ;;  %v3423_v11 = vmul.f32 %v1484_v45, %v1390_v28  ;;  %v2358_v46 = vadd.f32 -1.0, %v2869_v31 }
 0x552   :  { %v3425_v41 = vmul.f32 %v2574_v38, %v1106_v51  ;;  %v1199_v52 = vpop.f32.mrb[9].mxu0  ;;  %v1512_v21 = vmin.f32 %v3421_v40, 0.0  ;;  %v2357_v2 = vadd.f32 -1.0, %v2871_v30  ;;  %v1596_v51 = vld [vmem:[%s3614_s6 + $0x10] sm:$0xff]  ;;  %vm1508_vm14 = vcmp.gt.f32.partialorder %v3421_v40, 0.0 }
 0x553   :  { %v3428_v58 = vmul.f32 %v1199_v52, %v1105_v29  ;;  %v1511_v48 = vmin.f32 %v3423_v11, 0.0  ;;  %v958_v54 = vsel %vm938_vm4, %v3405_v14, %v2358_v46  ;;  %v1597_v29 = vld [vmem:[%s3614_s6 + $0x18] sm:$0xff]  ;;  %vm1507_vm11 = vcmp.gt.f32.partialorder %v3423_v11, 0.0 }
 0x554   :  { %v1227_v49 = vmin.f32 %v3425_v41, 0.0  ;;  %v1517_v13 = vmul.f32 1.442695, %v1512_v21  ;;  %1537 = vrot.lane.b32.xlu0 %v958_v54, %s2959_s1  ;;  %v957_v55 = vsel %vm937_vm5, %v3407_v36, %v2357_v2  ;;  %v2577_v57 = vpop.f32.mrb[10].mxu0  ;;  %v1392_v36 = vmul.f32 %v2865_v10, %v1388_v35  ;;  %v1594_v10 = vld [vmem:[%s3614_s6] sm:$0xff]  ;;  %s2960_s6 = smov 24  }
 0x555   :  { %v1226_v8 = vmin.f32 %v3428_v58, 0.0  ;;  %v1515_v61 = vmul.f32 1.442695, %v1511_v48  ;;  %1535 = vrot.lane.b32.xlu1 %v957_v55, %s2959_s1  ;;  %v3439_v63 = vmul.f32 %v2577_v57, %v1108_v39  ;;  %v1209_v0 = vpop.f32.mrb[11].mxu0  ;;  %v2710_v28 = vpack.c.bf16 %v1595_v19, %v1594_v10  ;;  %v1696_v55 = vld [vmem:[%s3615_s7 + $0x8] sm:$0xff] }
 0x556   :  { %v1232_v62 = vmul.f32 1.442695, %v1227_v49  ;;  %2876 = vpow2.f32 %v1517_v13  ;;  %v3441_v14 = vmul.f32 %v1209_v0, %v1107_v7  ;;  %v2714_v31 = vpack.c.bf16 %v1597_v29, %v1596_v51  ;;  %v1698_v7 = vld [vmem:[%s3615_s7 + $0x18] sm:$0xff] }
 0x557   :  { %v2873_v4 = vpop.eup %2872  ;;  %2878 = vpow2.f32 %v1515_v61  ;;  %v1230_v18 = vmul.f32 1.442695, %v1226_v8  ;;  %v1229_v12 = vmin.f32 %v3439_v63, 0.0  ;;  %v2591_v16 = vpop.f32.mrb[14].mxu1  ;;  %2711 = vmatprep.subr.bf16.mxu0 %v2710_v28  ;;  %vm1223_vm12 = vcmp.gt.f32.partialorder %v3425_v41, 0.0  ;;  %v1695_v8 = vld [vmem:[%s3615_s7] sm:$0xff] }
 0x558   :  { %v2875_v17 = vpop.eup %2874  ;;  %2880 = vpow2.f32 %v1232_v62  ;;  %v1228_v37 = vmin.f32 %v3441_v14, 0.0  ;;  %v3445_v20 = vmul.f32 %v2591_v16, %v1393_v3  ;;  %v1494_v56 = vpop.f32.mrb[15].mxu1  ;;  %v2360_v33 = vadd.f32 -1.0, %v2873_v4  ;;  %2713 = vmatpush3.bf16.msra.mxu0 %v2710_v28 }
 0x559   :  { %v3447_v42 = vmul.f32 %v1494_v56, %v1392_v36  ;;  %v2359_v15 = vadd.f32 -1.0, %v2875_v17  ;;  %2882 = vpow2.f32 %v1230_v18  ;;  %v1236_v25 = vmul.f32 1.442695, %v1229_v12  ;;  %2715 = vmatprep.subr.bf16.mxu0 %v2714_v31  ;;  %v521_v12 = vpop.xlane.xlu1 %520  ;;  %v524_v16 = vpop.xlane.xlu0 %523 }
 0x55a   :  { %v1234_v32 = vmul.f32 1.442695, %v1228_v37  ;;  %v960_v24 = vsel %vm940_vm7, %v3415_v27, %v2360_v33  ;;  %v1514_v27 = vmin.f32 %v3445_v20, 0.0  ;;  %vm1224_vm15 = vcmp.gt.f32.partialorder %v3441_v14, 0.0 }
 0x55b   :  { %v1513_v26 = vmin.f32 %v3447_v42, 0.0  ;;  %1541 = vrot.lane.b32.xlu1 %v960_v24, %s2959_s1  ;;  %v959_v22 = vsel %vm939_vm10, %v3417_v1, %v2359_v15  ;;  %vm1222_vm0 = vcmp.gt.f32.partialorder %v3428_v58, 0.0  ;;  %vm1509_vm1 = vcmp.gt.f32.partialorder %v3447_v42, 0.0 }
 0x55c   :  { %2884 = vpow2.f32 %v1234_v32  ;;  %1539 = vrot.lane.b32.xlu0 %v959_v22, %s2959_s1  ;;  %v1521_v23 = vmul.f32 1.442695, %v1514_v27  ;;  %2717 = vmatpush3.bf16.msra.mxu0 %v2714_v31  ;;  %v2718_v57 = vpack.c.bf16 %v1696_v55, %v1695_v8  ;;  %vm1225_vm4 = vcmp.gt.f32.partialorder %v3439_v63, 0.0 }
 0x55d   :  { %v1519_v43 = vmul.f32 1.442695, %v1513_v26  ;;  %vm1510_vm5 = vcmp.gt.f32.partialorder %v3445_v20, 0.0  ;;  %v531_v36 = vmax.f32 %v521_v12, 1e-30  ;;  %v527_v17 = vpop.xlane.xlu1 %526  ;;  %vm1579_vm7 = vcmask 64512  }
 0x55e   :  { %2719 = vmatprep.subr.bf16.mxu1 %v2718_v57  ;;  %v532_v37 = vmax.f32 %v524_v16, 1e-30  ;;  %v533_v56 = vmax.f32 %v527_v17, 1e-30 }
 0x55f   :  { %2886 = vpow2.f32 %v1519_v43  ;;  %2721 = vmatpush3.bf16.msra.mxu1 %v2718_v57 }
 0x560   :  { %v2877_v1 = vpop.eup %2876  ;;  %2888 = vpow2.f32 %v1236_v25 }
 0x561   :  { %v2879_v35 = vpop.eup %2878  ;;  %2890 = vpow2.f32 %v1521_v23  ;;  %v2374_v46 = vadd.f32 -1.0, %v2877_v1 }
 0x562   :  { %v2881_v45 = vpop.eup %2880  ;;  %v2373_v38 = vadd.f32 -1.0, %v2879_v35  ;;  %2892 = vrcp.f32 %v531_v36 }
 0x563   :  { %v2366_v39 = vadd.f32 -1.0, %v2881_v45  ;;  %v2883_v34 = vpop.eup %2882  ;;  %v1528_v48 = vsel %vm1508_vm14, %v3421_v40, %v2374_v46  ;;  %v1697_v40 = vld [vmem:[%s3615_s7 + $0x10] sm:$0xff]  ;;  %2894 = vrcp.f32 %v532_v37 }
 0x564   :  { %v1527_v30 = vsel %vm1507_vm11, %v3423_v11, %v2373_v38  ;;  %v2365_v54 = vadd.f32 -1.0, %v2883_v34  ;;  %2896 = vrcp.f32 %v533_v56 }
 0x565   :  { %1567 = vrot.lane.b32.xlu0 %v1527_v30, %s2960_s6  ;;  %v1243_v52 = vsel %vm1223_vm12, %v3425_v41, %v2366_v39  ;;  %vm1584_vm12 = vcmask 130048  }
 0x566   :  { %v2885_v21 = vpop.eup %2884  ;;  %1553 = vrot.lane.b32.xlu1 %v1243_v52, %s2961_s25  ;;  %v1242_v61 = vsel %vm1222_vm0, %v3428_v58, %v2365_v54 }
 0x567   :  { %v2367_v2 = vadd.f32 -1.0, %v2885_v21 }
 0x569   :  { %v2887_v11 = vpop.eup %2886  ;;  %v1244_v49 = vsel %vm1224_vm15, %v3441_v14, %v2367_v2  ;;  %v2722_v14 = vpack.c.bf16 %v1698_v7, %v1697_v40  ;;  %vm1589_vm15 = vcmask 195584  }
 0x56a   :  { %v2889_v13 = vpop.eup %2888  ;;  %1569 = vrot.lane.b32.xlu1 %v1528_v48, %s2960_s6  ;;  %1555 = vrot.lane.b32.xlu0 %v1244_v49, %s2961_s25  ;;  %v2375_v41 = vadd.f32 -1.0, %v2887_v11 }
 0x56b   :  { %v2368_v0 = vadd.f32 -1.0, %v2889_v13  ;;  %v2891_v3 = vpop.eup %2890  ;;  %2723 = vmatprep.subr.bf16.mxu1 %v2722_v14 }
 0x56c   :  { %v1529_v62 = vsel %vm1509_vm1, %v3447_v42, %v2375_v41  ;;  %v2376_v18 = vadd.f32 -1.0, %v2891_v3  ;;  %2725 = vmatpush3.bf16.msra.mxu1 %v2722_v14  ;;  %v2893_v42 = vpop.eup %2892 }
 0x56d   :  { %v1245_v4 = vsel %vm1225_vm4, %v3439_v63, %v2368_v0  ;;  %v530_v63 = vpop.xlane.xlu0 %529  ;;  %v2895_v15 = vpop.eup %2894  ;;  %v539_v32 = vmul.f32 %v2893_v42, %v531_v36 }
 0x56e   :  { %1551 = vrot.lane.b32.xlu1 %v1242_v61, %s2961_s25  ;;  %1571 = vrot.lane.b32.xlu0 %v1529_v62, %s2960_s6  ;;  %v1530_v58 = vsel %vm1510_vm5, %v3445_v20, %v2376_v18  ;;  %v534_v33 = vmax.f32 %v530_v63, 1e-30  ;;  %v2897_v24 = vpop.eup %2896  ;;  %v540_v10 = vmul.f32 %v2895_v15, %v532_v37 }
 0x56f   :  { %v543_v20 = vsub.f32 2.0, %v539_v32  ;;  %v541_v19 = vmul.f32 %v2897_v24, %v533_v56 }
 0x570   :  { %2898 = vrcp.f32 %v534_v33  ;;  %v544_v26 = vsub.f32 2.0, %v540_v10 }
 0x571   :  { %v545_v25 = vsub.f32 2.0, %v541_v19  ;;  %v547_v27 = vmul.f32 %v2893_v42, %v543_v20  ;;  %v1699_v20 = vld [vmem:[%s3615_s7 + $0x20] sm:$0xff] }
 0x572   :  { %1557 = vrot.lane.b32.xlu1 %v1245_v4, %s2961_s25  ;;  %v548_v28 = vmul.f32 %v2895_v15, %v544_v26  ;;  %2614 = vmatprep.subr.mxu1 %v1699_v20 }
 0x573   :  { %v648_v51 = vmul.f32 %v3396_v9, %v547_v27  ;;  %v549_v29 = vmul.f32 %v2897_v24, %v545_v25  ;;  %2615 = vmatpush3.msra.mxu1 %v1699_v20 }
 0x574   :  { %v649_v1 = vmul.f32 %v3394_v6, %v548_v28 }
 0x575   :  { %v650_v23 = vmul.f32 %v3413_v50, %v549_v29  ;;  %v656_v35 = vmin.f32 %v648_v51, 0.0  ;;  %vm652_vm10 = vcmp.gt.f32.partialorder %v648_v51, 0.0 }
 0x576   :  { %1573 = vrot.lane.b32.xlu1 %v1530_v58, %s2960_s6  ;;  %v657_v45 = vmin.f32 %v649_v1, 0.0  ;;  %vm653_vm11 = vcmp.gt.f32.partialorder %v649_v1, 0.0 }
 0x577   :  { %v658_v39 = vmin.f32 %v650_v23, 0.0  ;;  %v660_v34 = vmul.f32 1.442695, %v656_v35  ;;  %vm654_vm14 = vcmp.gt.f32.partialorder %v650_v23, 0.0 }
 0x578   :  { %v662_v52 = vmul.f32 1.442695, %v657_v45 }
 0x579   :  { %v664_v46 = vmul.f32 1.442695, %v658_v39  ;;  %2900 = vpow2.f32 %v660_v34 }
 0x57a   :  { %v2899_v22 = vpop.eup %2898  ;;  %2902 = vpow2.f32 %v662_v52 }
 0x57b   :  { %v542_v43 = vmul.f32 %v2899_v22, %v534_v33  ;;  %2904 = vpow2.f32 %v664_v46 }
 0x57d   :  { %v546_v31 = vsub.f32 2.0, %v542_v43 }
 0x57f   :  { %v550_v38 = vmul.f32 %v2899_v22, %v546_v31 }
 0x581   :  { %v651_v30 = vmul.f32 %v3410_v47, %v550_v38 }
 0x583   :  { %v659_v21 = vmin.f32 %v651_v30, 0.0  ;;  %v2901_v50 = vpop.eup %2900  ;;  %vm655_vm0 = vcmp.gt.f32.partialorder %v651_v30, 0.0 }
 0x584   :  { %v2903_v13 = vpop.eup %2902  ;;  %v2349_v8 = vadd.f32 -1.0, %v2901_v50 }
 0x585   :  { %v666_v11 = vmul.f32 1.442695, %v659_v21  ;;  %v2905_v41 = vpop.eup %2904  ;;  %v2350_v47 = vadd.f32 -1.0, %v2903_v13 }
 0x586   :  { %v2351_v57 = vadd.f32 -1.0, %v2905_v41  ;;  %v672_v61 = vsel %vm652_vm10, %v648_v51, %v2349_v8  ;;  %vm2962_vm10 = vmmov 1  }
 0x587   :  { %2906 = vpow2.f32 %v666_v11  ;;  %v673_v62 = vsel %vm653_vm11, %v649_v1, %v2350_v47 }
 0x588   :  { %v674_v4 = vsel %vm654_vm14, %v650_v23, %v2351_v57 }
 0x591   :  { %v2907_v7 = vpop.eup %2906 }
 0x592   :  { %v2352_v12 = vadd.f32 -1.0, %v2907_v7 }
 0x594   :  { %v675_v42 = vsel %vm655_vm0, %v651_v30, %v2352_v12 }
 0x5c6   :  { %v1538_v9 = vpop.permute.xlu0 %1537 }
 0x5c7   :  { %v1536_v2 = vpop.permute.xlu1 %1535  ;;  %v1581_v3 = vsel %vm1579_vm7, %v673_v62, %v1538_v9 }
 0x5c8   :  { %v1580_v0 = vsel %vm1579_vm7, %v672_v61, %v1536_v2 }
 0x5cd   :  { %v1542_v48 = vpop.permute.xlu1 %1541 }
 0x5ce   :  { %v1540_v6 = vpop.permute.xlu0 %1539  ;;  %v1583_v15 = vsel %vm1579_vm7, %v675_v42, %v1542_v48 }
 0x5cf   :  { %v1582_v16 = vsel %vm1579_vm7, %v674_v4, %v1540_v6 }
 0x5d7   :  { %v1568_v49 = vpop.permute.xlu0 %1567 }
 0x5d8   :  { %v1554_v54 = vpop.permute.xlu1 %1553 }
 0x5d9   :  { %v1586_v36 = vsel %vm1584_vm12, %v1581_v3, %v1554_v54 }
 0x5dc   :  { %v1570_v55 = vpop.permute.xlu1 %1569  ;;  %v1556_v40 = vpop.permute.xlu0 %1555 }
 0x5dd   :  { %v1591_v37 = vsel %vm1589_vm15, %v1586_v36, %v1570_v55  ;;  %v1587_v56 = vsel %vm1584_vm12, %v1582_v16, %v1556_v40 }
 0x5e0   :  { %v1552_v14 = vpop.permute.xlu1 %1551  ;;  %v1572_v58 = vpop.permute.xlu0 %1571 }
 0x5e1   :  { %v1585_v18 = vsel %vm1584_vm12, %v1580_v0, %v1552_v14  ;;  %v1592_v63 = vsel %vm1589_vm15, %v1587_v56, %v1572_v58 }
 0x5e2   :  { %v1590_v17 = vsel %vm1589_vm15, %v1585_v18, %v1568_v49 }
 0x5e3   :  { %2600 = vmatprep.mubr.msk.f32.mxu0 %vm272_vm3, %v1590_v17 }
 0x5e4   :  { %2601 = vmatmul.mubr.msk.f32.vlgmr.msra.gmra.mrb[12].mxu0 %vm272_vm3, %v1591_v37  ;;  %v1558_v33 = vpop.permute.xlu1 %1557 }
 0x5e5   :  { %2603 = vmatprep.mubr.msk.f32.mxu0 %vm272_vm3, %v1592_v63  ;;  %v1588_v32 = vsel %vm1584_vm12, %v1583_v15, %v1558_v33  ;;  %vm2322_vm12 = vcmask 7168  }
 0x5e8   :  { %v1574_v24 = vpop.permute.xlu1 %1573 }
 0x5e9   :  { %v1593_v10 = vsel %vm1589_vm15, %v1588_v32, %v1574_v24 }
 0x5ea   :  { %2604 = vmatmul.mubr.msk.f32.gmra.mrb[14].mxu0 %vm272_vm3, %v1593_v10 }
 0x6b7   :  { %v2602_v19 = vpop.f32.mrb[12].mxu0 }
 0x6b8   :  { %v1676_v26 = vpop.f32.mrb[13].mxu0 }
 0x6b9   :  { %v2726_v22 = vpack.c.bf16 %v2602_v19, %v1676_v26  ;;  %2616 = vmatprep.mubr.msk.f32.mxu1 %vm170_vm2, %v1676_v26 }
 0x6ba   :  { %2617 = vmatmul.mubr.msk.f32.vlgmr.msra.gmra.mrb[16].mxu1 %vm170_vm2, %v2602_v19 }
 0x6bb   :  { %2727 = vmatprep.subr.bf16.mxu0 %v2726_v22 }
 0x6bc   :  { %2729 = vmatpush3.bf16.msra.mxu0 %v2726_v22 }
 0x6bd   :  { %v2605_v25 = vpop.f32.mrb[14].mxu0 }
 0x6be   :  { %v1686_v27 = vpop.f32.mrb[15].mxu0 }
 0x6bf   :  { %v2730_v43 = vpack.c.bf16 %v2605_v25, %v1686_v27  ;;  %2619 = vmatprep.mubr.msk.f32.mxu1 %vm170_vm2, %v1686_v27 }
 0x6c0   :  { %2620 = vmatmul.mubr.msk.f32.gmra.mrb[18].mxu1 %vm170_vm2, %v2605_v25 }
 0x6c1   :  { %2731 = vmatprep.subr.bf16.mxu0 %v2730_v43 }
 0x6c2   :  { %2733 = vmatpush3.bf16.msra.mxu0 %v2730_v43 }
 0x78d   :  { %v2618_v28 = vpop.f32.mrb[16].mxu1 }
 0x78e   :  { %1803 = vrot.lane.b32.xlu1 %v2618_v28, %s2953_s2  ;;  %v1778_v51 = vpop.f32.mrb[17].mxu1 }
 0x78f   :  { %1801 = vrot.lane.b32.xlu0 %v1778_v51, %s2953_s2 }
 0x793   :  { %v2621_v29 = vpop.f32.mrb[18].mxu1 }
 0x794   :  { %1807 = vrot.lane.b32.xlu1 %v2621_v29, %s2953_s2  ;;  %v1788_v31 = vpop.f32.mrb[19].mxu1 }
 0x795   :  { %1805 = vrot.lane.b32.xlu0 %v1788_v31, %s2953_s2 }
 0x798   :  { %1850 = vperm.xlu1 %2811, %v2618_v28   ;;  %v2074_v28 = vld [vmem:[%s3616_s8] sm:$0xff] }
 0x799   :  { %1846 = vperm.xlu0 %2810, %v1778_v51   ;;  %v2734_v51 = vpack.c.bf16 %v2075_v5, %v2074_v28 }
 0x79b   :  { %2735 = vmatprep.subr.bf16.mxu1 %v2734_v51 }
 0x79c   :  { %1854 = vperm.xlu1 %2811, %v1788_v31   ;;  %2737 = vmatpush3.bf16.msra.mxu1 %v2734_v51 }
 0x79d   :  { %1858 = vperm.xlu0 %2810, %v2621_v29   ;;  %v2076_v29 = vld [vmem:[%s3616_s8 + $0x10] sm:$0xff] }
 0x79e   :  { %v2738_v31 = vpack.c.bf16 %v2077_v53, %v2076_v29 }
 0x7a0   :  { %2739 = vmatprep.subr.bf16.mxu1 %v2738_v31 }
 0x7a1   :  { %2741 = vmatpush3.bf16.msra.mxu1 %v2738_v31 }
 0x800   :  { %v1804_v23 = vpop.permute.xlu1 %1803 }
 0x801   :  { %v1802_v1 = vpop.permute.xlu0 %1801 }
 0x802   :  { %1813 = vxpose.xlu1.b32.start [1/4] (short) (narrow) %v1802_v1, 8  ;;  %v2078_v1 = vld [vmem:[%s3616_s8 + $0x20] sm:$0xff] }
 0x803   :  { %2644 = vmatprep.subr.mxu1 %v2078_v1 }
 0x804   :  { %2645 = vmatpush3.msra.mxu1 %v2078_v1 }
 0x806   :  { %1814 = vxpose.xlu1.b32.cont [2/4] (short) (narrow) %v1804_v23, 8  ;;  %v1808_v45 = vpop.permute.xlu1 %1807 }
 0x807   :  { %v1806_v35 = vpop.permute.xlu0 %1805 }
 0x80a   :  { %1815 = vxpose.xlu1.b32.cont [3/4] (short) (narrow) %v1806_v35, 8 }
 0x80e   :  { %1816 = vxpose.xlu1.b32.end [4/4] (short) (narrow) %v1808_v45, 8 }
 0x817   :  { %v1851_v38 = vpop.permute.xlu1 %1850 }
 0x818   :  { %v1847_v30 = vpop.permute.xlu0 %1846 }
 0x81b   :  { %v1855_v39 = vpop.permute.xlu1 %1854 }
 0x81c   :  { %v1859_v48 = vpop.permute.xlu0 %1858 }
 0x882   :  { %v1829_v34 = vpop.trf.xlu1 }
 0x883   :  { %v1864_v52 = vrot.slane %v1829_v34, %v3150_v44 }
 0x885   :  { %v1865_v46 = vadd.f32 %v1864_v52, %v1847_v30  ;;  %v1866_v21 = vadd.f32 %v1864_v52, %v1851_v38  ;;  %v1867_v9 = vadd.f32 %v1864_v52, %v1855_v39  ;;  %v1868_v54 = vadd.f32 %v1864_v52, %v1859_v48 }
 0x887   :  { %vm1869_vm1 = vcmp.gt.f32.partialorder %v1865_v46, 0.0  ;;  %v1873_v2 = vmul.f32 0.2, %v1865_v46  ;;  %vm1870_vm4 = vcmp.gt.f32.partialorder %v1866_v21, 0.0  ;;  %v1874_v11 = vmul.f32 0.2, %v1866_v21 }
 0x888   :  { %v1875_v49 = vmul.f32 0.2, %v1867_v9  ;;  %vm1871_vm5 = vcmp.gt.f32.partialorder %v1867_v9, 0.0  ;;  %v1876_v47 = vmul.f32 0.2, %v1868_v54  ;;  %vm1872_vm7 = vcmp.gt.f32.partialorder %v1868_v54, 0.0 }
 0x889   :  { %v1877_v6 = vsel %vm1869_vm1, %v1865_v46, %v1873_v2  ;;  %v1878_v50 = vsel %vm1870_vm4, %v1866_v21, %v1874_v11 }
 0x88a   :  { %v1881_v13 = vsel %vm3161_vm9, %v1877_v6, 3e+38  ;;  %v1882_v44 = vsel %vm3157_vm8, %v1878_v50, 3e+38  ;;  %v1879_v8 = vsel %vm1871_vm5, %v1867_v9, %v1875_v49  ;;  %v1880_v57 = vsel %vm1872_vm7, %v1868_v54, %v1876_v47 }
 0x88b   :  { %v1885_v41 = vsel %vm272_vm3, %v1881_v13, inf  ;;  %v1888_v55 = vsel %vm272_vm3, %v1882_v44, inf  ;;  %v1883_v40 = vsel %vm3169_vm13, %v1879_v8, 3e+38  ;;  %v1884_v61 = vsel %vm3220_vm6, %v1880_v57, 3e+38 }
 0x88c   :  { %1886 = vmin.xlane.f32.xlu0 %v1885_v41  ;;  %v1891_v7 = vsel %vm272_vm3, %v1883_v40, inf  ;;  %v1894_v62 = vsel %vm272_vm3, %v1884_v61, inf }
 0x890   :  { %1889 = vmin.xlane.f32.xlu0 %v1888_v55 }
 0x894   :  { %1892 = vmin.xlane.f32.xlu0 %v1891_v7 }
 0x898   :  { %1895 = vmin.xlane.f32.xlu0 %v1894_v62 }
 0x919   :  { %v1887_v0 = vpop.xlane.xlu0 %1886 }
 0x91a   :  { %v1897_v14 = vsub.f32 %v1887_v0, %v1877_v6 }
 0x91c   :  { %v1901_v3 = vmin.f32 %v1897_v14, 0.0 }
 0x91d   :  { %v1890_v4 = vpop.xlane.xlu0 %1889 }
 0x91e   :  { %v1905_v18 = vmul.f32 1.442695, %v1901_v3  ;;  %v1898_v58 = vsub.f32 %v1890_v4, %v1878_v50 }
 0x920   :  { %2908 = vpow2.f32 %v1905_v18  ;;  %v1902_v12 = vmin.f32 %v1898_v58, 0.0 }
 0x921   :  { %v1893_v16 = vpop.xlane.xlu0 %1892 }
 0x922   :  { %v1907_v36 = vmul.f32 1.442695, %v1902_v12  ;;  %v1899_v17 = vsub.f32 %v1893_v16, %v1879_v8 }
 0x924   :  { %2910 = vpow2.f32 %v1907_v36  ;;  %v1903_v37 = vmin.f32 %v1899_v17, 0.0 }
 0x925   :  { %v1896_v56 = vpop.xlane.xlu0 %1895 }
 0x926   :  { %v1909_v63 = vmul.f32 1.442695, %v1903_v37  ;;  %v1900_v33 = vsub.f32 %v1896_v56, %v1880_v57 }
 0x928   :  { %2912 = vpow2.f32 %v1909_v63  ;;  %v1904_v42 = vmin.f32 %v1900_v33, 0.0 }
 0x92a   :  { %v2909_v15 = vpop.eup %2908  ;;  %v1911_v32 = vmul.f32 1.442695, %v1904_v42 }
 0x92b   :  { %v1913_v24 = vsel %vm3161_vm9, %v2909_v15, 0.0 }
 0x92c   :  { %2914 = vpow2.f32 %v1911_v32  ;;  %2630 = vmatprep.mubr.msk.f32.mxu0 %vm272_vm3, %v1913_v24  ;;  %v1917_v10 = vsel %vm272_vm3, %v1913_v24, 0.0 }
 0x92d   :  { %1918 = vadd.xlane.f32.xlu0 %v1917_v10 }
 0x92e   :  { %v2911_v20 = vpop.eup %2910 }
 0x92f   :  { %v1914_v19 = vsel %vm3157_vm8, %v2911_v20, 0.0 }
 0x930   :  { %2631 = vmatmul.mubr.msk.f32.vlgmr.msra.gmra.mrb[16].mxu0 %vm272_vm3, %v1914_v19  ;;  %v1920_v26 = vsel %vm272_vm3, %v1914_v19, 0.0 }
 0x931   :  { %1921 = vadd.xlane.f32.xlu0 %v1920_v26 }
 0x932   :  { %v2913_v22 = vpop.eup %2912 }
 0x933   :  { %v1915_v60 = vsel %vm3169_vm13, %v2913_v22, 0.0 }
 0x934   :  { %2633 = vmatprep.mubr.msk.f32.mxu0 %vm272_vm3, %v1915_v60  ;;  %v1923_v25 = vsel %vm272_vm3, %v1915_v60, 0.0  ;;  %v2187_v60 = vld [vmem:[%s3617_s10] sm:$0xff] }
 0x935   :  { %1924 = vadd.xlane.f32.xlu1 %v1923_v25  ;;  %v2188_v25 = vld [vmem:[%s3617_s10 + $0x8] sm:$0x3] }
 0x936   :  { %v2915_v27 = vpop.eup %2914 }
 0x937   :  { %v1916_v43 = vsel %vm3220_vm6, %v2915_v27, 0.0  ;;  %vm2209_vm6 = vcmask 1041408   ;;  %v2742_v27 = vpack.c.bf16 %v2188_v25, %v2187_v60 }
 0x938   :  { %2634 = vmatmul.mubr.msk.f32.gmra.mrb[18].mxu0 %vm272_vm3, %v1916_v43  ;;  %v1926_v59 = vsel %vm272_vm3, %v1916_v43, 0.0  ;;  %vm2743_vm11 = vmpackc.low %vm2209_vm6, %vm2962_vm10  ;;  %v17_v43 = vstv %s3618_s11 }
 0x939   :  { %1927 = vadd.xlane.f32.xlu0 %v1926_v59  ;;  %2744 = vmatprep.subr.msk.bf16.mxu0 %vm2743_vm11, %v2742_v27  ;;  %18 = vst [vmem:[#allocation2] sm:$0x1] %v17_v43  ;;  %v2393_v59 = vld [vmem:[%s3619_s9] ss:$0 sm:$0xff] }
 0x93a   :  { %2747 = vmatpush3.bf16.msk.msra.mxu0 %vm2743_vm11, %v2742_v27 }
 0x9ba   :  { %v1919_v23 = vpop.xlane.xlu0 %1918 }
 0x9bb   :  { %v1929_v38 = vmax.f32 %v1919_v23, 1e-30 }
 0x9be   :  { %v1922_v35 = vpop.xlane.xlu0 %1921 }
 0x9bf   :  { %v1930_v45 = vmax.f32 %v1922_v35, 1e-30 }
 0x9c1   :  { %2916 = vrcp.f32 %v1930_v45 }
 0x9c2   :  { %2918 = vrcp.f32 %v1929_v38  ;;  %v1925_v30 = vpop.xlane.xlu1 %1924 }
 0x9c3   :  { %v1931_v52 = vmax.f32 %v1925_v30, 1e-30  ;;  %v2398_v30 = vld [vmem:[#allocation2] ss:$0 sm:$0xff] }
 0x9c6   :  { %v1928_v39 = vpop.xlane.xlu0 %1927 }
 0x9c7   :  { %v1932_v34 = vmax.f32 %v1928_v39, 1e-30 }
 0x9c9   :  { %2920 = vrcp.f32 %v1932_v34 }
 0x9ca   :  { %2922 = vrcp.f32 %v1931_v52 }
 0x9cb   :  { %v2917_v46 = vpop.eup %2916 }
 0x9cc   :  { %v2919_v21 = vpop.eup %2918  ;;  %v1938_v9 = vmul.f32 %v2917_v46, %v1930_v45 }
 0x9cd   :  { %v1937_v2 = vmul.f32 %v2919_v21, %v1929_v38 }
 0x9ce   :  { %v1942_v11 = vsub.f32 2.0, %v1938_v9 }
 0x9cf   :  { %v1941_v6 = vsub.f32 2.0, %v1937_v2 }
 0x9d0   :  { %v1946_v54 = vmul.f32 %v2917_v46, %v1942_v11 }
 0x9d1   :  { %v1945_v44 = vmul.f32 %v2919_v21, %v1941_v6 }
 0x9d3   :  { %v2921_v48 = vpop.eup %2920 }
 0x9d4   :  { %v2923_v50 = vpop.eup %2922  ;;  %v1940_v49 = vmul.f32 %v2921_v48, %v1932_v34 }
 0x9d5   :  { %v1939_v13 = vmul.f32 %v2923_v50, %v1931_v52 }
 0x9d6   :  { %v1944_v40 = vsub.f32 2.0, %v1940_v49 }
 0x9d7   :  { %v1943_v7 = vsub.f32 2.0, %v1939_v13 }
 0x9d8   :  { %v1948_v14 = vmul.f32 %v2921_v48, %v1944_v40 }
 0x9d9   :  { %v1947_v4 = vmul.f32 %v2923_v50, %v1943_v7 }
 0xa03   :  { %v2632_v41 = vpop.f32.mrb[16].mxu0 }
 0xa04   :  { %v2047_v8 = vmul.f32 %v2632_v41, %v1946_v54  ;;  %v2027_v47 = vpop.f32.mrb[17].mxu0 }
 0xa05   :  { %v2046_v55 = vmul.f32 %v2027_v47, %v1945_v44 }
 0xa06   :  { %v2055_v57 = vmin.f32 %v2047_v8, 0.0  ;;  %vm2051_vm8 = vcmp.gt.f32.partialorder %v2047_v8, 0.0 }
 0xa07   :  { %v2054_v61 = vmin.f32 %v2046_v55, 0.0  ;;  %vm2050_vm3 = vcmp.gt.f32.partialorder %v2046_v55, 0.0 }
 0xa08   :  { %v2060_v62 = vmul.f32 1.442695, %v2055_v57 }
 0xa09   :  { %v2058_v0 = vmul.f32 1.442695, %v2054_v61 }
 0xa0a   :  { %2924 = vpow2.f32 %v2060_v62 }
 0xa0b   :  { %2926 = vpow2.f32 %v2058_v0  ;;  %v2635_v3 = vpop.f32.mrb[18].mxu0 }
 0xa0c   :  { %v2049_v18 = vmul.f32 %v2635_v3, %v1948_v14  ;;  %v2037_v58 = vpop.f32.mrb[19].mxu0 }
 0xa0d   :  { %v2048_v12 = vmul.f32 %v2037_v58, %v1947_v4 }
 0xa0e   :  { %v2057_v16 = vmin.f32 %v2049_v18, 0.0  ;;  %vm2053_vm13 = vcmp.gt.f32.partialorder %v2049_v18, 0.0 }
 0xa0f   :  { %v2056_v36 = vmin.f32 %v2048_v12, 0.0  ;;  %vm2052_vm9 = vcmp.gt.f32.partialorder %v2048_v12, 0.0 }
 0xa10   :  { %v2064_v17 = vmul.f32 1.442695, %v2057_v16 }
 0xa11   :  { %v2062_v37 = vmul.f32 1.442695, %v2056_v36 }
 0xa12   :  { %2928 = vpow2.f32 %v2064_v17 }
 0xa13   :  { %2930 = vpow2.f32 %v2062_v37 }
 0xa14   :  { %v2925_v56 = vpop.eup %2924 }
 0xa15   :  { %v2927_v63 = vpop.eup %2926  ;;  %v2390_v33 = vadd.f32 -1.0, %v2925_v56 }
 0xa16   :  { %v2389_v42 = vadd.f32 -1.0, %v2927_v63 }
 0xa17   :  { %v2071_v32 = vsel %vm2051_vm8, %v2047_v8, %v2390_v33 }
 0xa18   :  { %v2070_v15 = vsel %vm2050_vm3, %v2046_v55, %v2389_v42 }
 0xa19   :  { %2646 = vmatprep.mubr.msk.f32.mxu1 %vm170_vm2, %v2070_v15 }
 0xa1a   :  { %2647 = vmatmul.mubr.msk.f32.vlgmr.msra.gmra.mrb[20].mxu1 %vm170_vm2, %v2071_v32 }
 0xa1c   :  { %v2929_v24 = vpop.eup %2928 }
 0xa1d   :  { %v2931_v10 = vpop.eup %2930  ;;  %v2392_v20 = vadd.f32 -1.0, %v2929_v24 }
 0xa1e   :  { %v2391_v19 = vadd.f32 -1.0, %v2931_v10 }
 0xa1f   :  { %v2073_v22 = vsel %vm2053_vm13, %v2049_v18, %v2392_v20 }
 0xa20   :  { %v2072_v26 = vsel %vm2052_vm9, %v2048_v12, %v2391_v19 }
 0xa21   :  { %2649 = vmatprep.mubr.msk.f32.mxu1 %vm170_vm2, %v2072_v26 }
 0xa22   :  { %2650 = vmatmul.mubr.msk.f32.gmra.mrb[22].mxu1 %vm170_vm2, %v2073_v22  ;;  %vm2196_vm2 = vcmask 80896  }
 0xaed   :  { %v2648_v28 = vpop.f32.mrb[20].mxu1 }
 0xaee   :  { %v2170_v5 = vadd.f32 %v2648_v28, %v2393_v59  ;;  %v2164_v51 = vpop.f32.mrb[21].mxu1 }
 0xaef   :  { %v2165_v29 = vadd.f32 %v2393_v59, %v2164_v51 }
 0xaf0   :  { %v2184_v31 = vmax.f32 %v2170_v5, 0.0 }
 0xaf1   :  { %v2183_v53 = vmax.f32 %v2165_v29, 0.0 }
 0xaf3   :  { %2656 = vmatprep.mubr.msk.f32.mxu0 %vm2196_vm2, %v2183_v53 }
 0xaf4   :  { %2657 = vmatmul.mubr.msk.f32.vlgmr.msra.gmra.mrb[20].mxu0 %vm2196_vm2, %v2184_v31 }
 0xaf5   :  { %v2651_v1 = vpop.f32.mrb[22].mxu1 }
 0xaf6   :  { %v2180_v23 = vadd.f32 %v2651_v1, %v2393_v59  ;;  %v2174_v35 = vpop.f32.mrb[23].mxu1 }
 0xaf7   :  { %v2175_v45 = vadd.f32 %v2393_v59, %v2174_v35 }
 0xaf8   :  { %v2186_v39 = vmax.f32 %v2180_v23, 0.0 }
 0xaf9   :  { %v2185_v38 = vmax.f32 %v2175_v45, 0.0 }
 0xafb   :  { %2659 = vmatprep.mubr.msk.f32.mxu0 %vm2196_vm2, %v2185_v38 }
 0xafc   :  { %2660 = vmatmul.mubr.msk.f32.gmra.mrb[22].mxu0 %vm2196_vm2, %v2186_v39 }
 0xbc7   :  { %v2658_v34 = vpop.f32.mrb[20].mxu0 }
 0xbc8   :  { %v2285_v52 = vadd.f32 %v2658_v34, %v2398_v30  ;;  %v2279_v46 = vpop.f32.mrb[21].mxu0 }
 0xbc9   :  { %v2280_v21 = vadd.f32 %v2398_v30, %v2279_v46 }
 0xbca   :  { %v2299_v9 = vsub.f32 0.0, %v2285_v52 }
 0xbcb   :  { %v2298_v2 = vsub.f32 0.0, %v2280_v21 }
 0xbcc   :  { %v2304_v11 = vmul.f32 1.442695, %v2299_v9 }
 0xbcd   :  { %v2302_v48 = vmul.f32 1.442695, %v2298_v2 }
 0xbce   :  { %2932 = vpow2.f32 %v2304_v11 }
 0xbcf   :  { %2934 = vpow2.f32 %v2302_v48  ;;  %v2661_v6 = vpop.f32.mrb[22].mxu0 }
 0xbd0   :  { %v2295_v50 = vadd.f32 %v2661_v6, %v2398_v30  ;;  %v2289_v49 = vpop.f32.mrb[23].mxu0 }
 0xbd1   :  { %v2290_v54 = vadd.f32 %v2398_v30, %v2289_v49 }
 0xbd2   :  { %v2301_v13 = vsub.f32 0.0, %v2295_v50 }
 0xbd3   :  { %v2300_v41 = vsub.f32 0.0, %v2290_v54 }
 0xbd4   :  { %v2308_v44 = vmul.f32 1.442695, %v2301_v13 }
 0xbd5   :  { %v2306_v8 = vmul.f32 1.442695, %v2300_v41 }
 0xbd6   :  { %2936 = vpow2.f32 %v2308_v44 }
 0xbd7   :  { %2938 = vpow2.f32 %v2306_v8 }
 0xbd8   :  { %v2933_v47 = vpop.eup %2932 }
 0xbd9   :  { %v2935_v55 = vpop.eup %2934  ;;  %v2311_v40 = vadd.f32 1.0, %v2933_v47 }
 0xbda   :  { %v2310_v57 = vadd.f32 1.0, %v2935_v55 }
 0xbdb   :  { %2940 = vrcp.f32 %v2311_v40 }
 0xbdc   :  { %2942 = vrcp.f32 %v2310_v57 }
 0xbe0   :  { %v2937_v7 = vpop.eup %2936 }
 0xbe1   :  { %v2939_v61 = vpop.eup %2938  ;;  %v2313_v62 = vadd.f32 1.0, %v2937_v7 }
 0xbe2   :  { %v2312_v0 = vadd.f32 1.0, %v2939_v61 }
 0xbe3   :  { %2944 = vrcp.f32 %v2313_v62 }
 0xbe4   :  { %2946 = vrcp.f32 %v2312_v0 }
 0xbe5   :  { %v2941_v14 = vpop.eup %2940 }
 0xbe6   :  { %v2943_v3 = vpop.eup %2942  ;;  %2324 = vst.msk [vmem:[%s3620_s12 + $0x8] sm:$0xff] %vm2322_vm12, %v2941_v14 }
 0xbe7   :  { %2323 = vst.msk [vmem:[%s3620_s12] sm:$0xff] %vm2322_vm12, %v2943_v3 }
 0xbed   :  { %v2945_v4 = vpop.eup %2944 }
 0xbee   :  { %v2947_v18 = vpop.eup %2946  ;;  %2326 = vst.msk [vmem:[%s3620_s12 + $0x18] sm:$0xff] %vm2322_vm12, %v2945_v4 }
 0xbef   :  { %2325 = vst.msk [vmem:[%s3620_s12 + $0x10] sm:$0xff] %vm2322_vm12, %v2947_v18 }

</bundles_post_ra>
